<compile_context>
chip_gen: v7x
topology: tpu7x:2x2x1
jax: 0.10.0
libtpu: 0.0.40
codegen_flags: <defaults>
</compile_context>

<pallas_src>
import functools

import jax
import jax.numpy as jnp
from jax.experimental import pallas as pl
from jax.experimental.pallas import tpu as pltpu


# ----------------------------------------------------------------------------
# Shared: conv1 (tiny K) + LeakyReLU on the VPU, f32 accumulation
# ----------------------------------------------------------------------------
def _conv1_lrelu(x, w1t_ref, b1_ref):
    """x: (Cin, TM) ; w1t_ref: (Cin, C1, 1) f32 ; b1_ref: (C1, 1) f32 -> (C1, TM) f32."""
    cin = w1t_ref.shape[0]
    acc = w1t_ref[0] * x[0:1, :]                 # (C1,1) x (1,TM) -> (C1,TM) broadcasts
    for c in range(1, cin):                      # Cin <= 4: short static chain
        acc = acc + w1t_ref[c] * x[c:c + 1, :]
    h = acc + b1_ref[...]
    return jnp.maximum(h, 0.2 * h)               # LeakyReLU(0.2)


# ----------------------------------------------------------------------------
# Pass 1: BatchNorm batch statistics of the conv2 output
# ----------------------------------------------------------------------------
def _stats_kernel(x_ref, w1t_ref, b1_ref, w2_ref, stat_ref, sum_acc, sq_acc,
                  *, hw, tile, mask_tail):
    """Partial per-channel sum / sum-of-squares of z = conv2(lrelu(conv1(x))).

    x_ref:    (1, Cin, TM) f32   pixels on lanes
    w1t_ref:  (Cin, C1, 1) f32
    b1_ref:   (C1, 1)      f32
    w2_ref:   (C2, C1)     bf16
    stat_ref: (1, 1, C2, 2) f32  [..., 0]=sum, [..., 1]=sum of squares (per (n, split))
    sum_acc/sq_acc: (C2, LB) f32 VMEM scratch (lane-wide accumulators)
    """
    k = pl.program_id(2)

    @pl.when(k == 0)
    def _():
        sum_acc[...] = jnp.zeros_like(sum_acc)
        sq_acc[...] = jnp.zeros_like(sq_acc)

    h = _conv1_lrelu(x_ref[0], w1t_ref, b1_ref).astype(jnp.bfloat16)
    z = jnp.dot(w2_ref[...], h, preferred_element_type=jnp.float32)   # (C2, TM) f32

    if mask_tail:   # only traced in when the pixel axis was padded
        pix0 = (pl.program_id(1) * pl.num_programs(2) + k) * tile
        lane = jax.lax.broadcasted_iota(jnp.int32, z.shape, 1)
        z = jnp.where(lane < (hw - pix0), z, 0.0)

    zsq = z * z
    lb = sum_acc.shape[1]
    s_p = z[:, 0:lb]
    q_p = zsq[:, 0:lb]
    for b in range(1, tile // lb):               # fold lane blocks (static, aligned)
        s_p = s_p + z[:, b * lb:(b + 1) * lb]
        q_p = q_p + zsq[:, b * lb:(b + 1) * lb]
    sum_acc[...] += s_p
    sq_acc[...] += q_p

    # Cross-lane reduce + narrow packed write only once, at the end of the reduction.
    @pl.when(k == pl.num_programs(2) - 1)
    def _():
        stat_ref[0, 0, :, 0:1] = jnp.sum(sum_acc[...], axis=1, keepdims=True)
        stat_ref[0, 0, :, 1:2] = jnp.sum(sq_acc[...], axis=1, keepdims=True)


# ----------------------------------------------------------------------------
# Pass 2: fused conv1 + LReLU + conv2 + BN(epilogue) + LReLU + conv3
# ----------------------------------------------------------------------------
def _apply_kernel(x_ref, w1t_ref, b1_ref, w2_ref, sc_ref, sh_ref, w3_ref, o_ref):
    """x_ref: (1, Cin, TM) f32 ; o_ref: (1, 1, TM) f32 (lane-dense pixel tile)."""
    h = _conv1_lrelu(x_ref[0], w1t_ref, b1_ref).astype(jnp.bfloat16)
    z = jnp.dot(w2_ref[...], h, preferred_element_type=jnp.float32)   # MXU: (C2, TM)
    g = z * sc_ref[...] + sh_ref[...]                                 # BatchNorm, f32
    g = jnp.maximum(g, 0.2 * g)                                       # LeakyReLU(0.2)
    # conv3 (128 -> 1) on VPU/XLU: broadcast-multiply + sublane reduction.
    o_ref[0] = jnp.sum(w3_ref[...] * g, axis=0, keepdims=True).astype(o_ref.dtype)


# ----------------------------------------------------------------------------
# Wrapper
# ----------------------------------------------------------------------------
def _pick_tile(hw, cap=2048):
    if hw <= 128:
        return hw                                  # single block == full dim
    for t in (cap, 1024, 512, 256, 128):
        if hw % t == 0:
            return t
    return 128                                     # caller pads hw to a multiple of 128


def pixel_discriminator_forward(params, x_nchw, *, eps=1e-5):
    w1, b1, w2, gamma, beta, w3 = params
    N, Cin, H, W = x_nchw.shape
    C1, C2 = w1.shape[0], w2.shape[0]
    HW = H * W

    TM = _pick_tile(HW)
    if HW % TM == 0:
        HW_pad, mask_tail = HW, False
    else:
        HW_pad = ((HW + 127) // 128) * 128
        TM = _pick_tile(HW_pad)
        mask_tail = True
    nT = HW_pad // TM
    LB = min(TM, 128)

    # Free reshape (NCHW is already channel-major); x keeps its native dtype (no extra
    # HBM round trip for a standalone cast).
    x = x_nchw.reshape(N, Cin, HW)
    if mask_tail:
        x = jnp.pad(x, ((0, 0), (0, 0), (0, HW_pad - HW)))

    # Tiny, resident weights (host-side prep is negligible).
    w1t = jnp.transpose(w1).reshape(Cin, C1, 1).astype(jnp.float32)   # per-input-channel columns
    b1c = b1.reshape(C1, 1).astype(jnp.float32)
    w2b = w2.astype(jnp.bfloat16)
    w3c = w3.reshape(C2, 1).astype(jnp.float32)

    # -------- pass 1: BatchNorm2d (train mode) batch statistics of conv2 out --------
    S = 2 if (nT % 2 == 0 and nT >= 2) else 1      # second parallel axis (v7x megacore)
    nTs = nT // S
    stats_kernel = functools.partial(_stats_kernel, hw=HW, tile=TM, mask_tail=mask_tail)
    stats = pl.pallas_call(
        stats_kernel,
        out_shape=jax.ShapeDtypeStruct((N, S, C2, 2), jnp.float32),
        grid=(N, S, nTs),
        in_specs=[
            pl.BlockSpec((1, Cin, TM), lambda n, s, k: (n, 0, s * nTs + k)),
            pl.BlockSpec((Cin, C1, 1), lambda n, s, k: (0, 0, 0)),
            pl.BlockSpec((C1, 1), lambda n, s, k: (0, 0)),
            pl.BlockSpec((C2, C1), lambda n, s, k: (0, 0)),
        ],
        out_specs=pl.BlockSpec((1, 1, C2, 2), lambda n, s, k: (n, s, 0, 0)),
        scratch_shapes=[pltpu.VMEM((C2, LB), jnp.float32),
                        pltpu.VMEM((C2, LB), jnp.float32)],
        compiler_params=pltpu.CompilerParams(
            dimension_semantics=("parallel", "parallel", "arbitrary")),
    )(x, w1t, b1c, w2b)

    cnt = jnp.float32(N * HW)
    mean = jnp.sum(stats[..., 0], axis=(0, 1)) / cnt
    var = jnp.sum(stats[..., 1], axis=(0, 1)) / cnt - mean * mean     # biased, like torch BN
    var = jnp.maximum(var, 0.0)                                       # guard cancellation
    inv = jax.lax.rsqrt(var + eps)
    scale = (gamma * inv).reshape(C2, 1).astype(jnp.float32)
    shift = (beta - mean * gamma * inv).reshape(C2, 1).astype(jnp.float32)

    # -------- pass 2: fused conv1 + LReLU + conv2 + BN + LReLU + conv3 ---------------
    out = pl.pallas_call(
        _apply_kernel,
        out_shape=jax.ShapeDtypeStruct((N, 1, HW_pad), jnp.float32),
        grid=(N, nT),
        in_specs=[
            pl.BlockSpec((1, Cin, TM), lambda n, t: (n, 0, t)),
            pl.BlockSpec((Cin, C1, 1), lambda n, t: (0, 0, 0)),
            pl.BlockSpec((C1, 1), lambda n, t: (0, 0)),
            pl.BlockSpec((C2, C1), lambda n, t: (0, 0)),
            pl.BlockSpec((C2, 1), lambda n, t: (0, 0)),
            pl.BlockSpec((C2, 1), lambda n, t: (0, 0)),
            pl.BlockSpec((C2, 1), lambda n, t: (0, 0)),
        ],
        out_specs=pl.BlockSpec((1, 1, TM), lambda n, t: (n, 0, t)),
        compiler_params=pltpu.CompilerParams(
            dimension_semantics=("parallel", "parallel")),
    )(x, w1t, b1c, w2b, scale, shift, w3c)

    return out[:, :, :HW].reshape(N, 1, H, W)


# ----------------------------------------------------------------------------
# Parameters (deterministic random init; cannot load PyTorch's random init here)
# ----------------------------------------------------------------------------
def init_params(key, input_nc, ndf=64):
    k1, kb1, k2, k3 = jax.random.split(key, 4)
    w1 = jax.random.normal(k1, (ndf, input_nc), jnp.float32) * (1.0 / input_nc) ** 0.5
    b1 = 0.1 * jax.random.normal(kb1, (ndf,), jnp.float32)
    w2 = jax.random.normal(k2, (2 * ndf, ndf), jnp.float32) * (1.0 / ndf) ** 0.5
    gamma = jnp.ones((2 * ndf,), jnp.float32)    # BatchNorm2d affine init
    beta = jnp.zeros((2 * ndf,), jnp.float32)
    w3 = jax.random.normal(k3, (1, 2 * ndf), jnp.float32) * (1.0 / (2 * ndf)) ** 0.5
    return (w1, b1, w2, gamma, beta, w3)


# ----------------------------------------------------------------------------
# Pure-JAX f32 reference (for correctness verification only)
# ----------------------------------------------------------------------------
def _ref_forward(params, x_nchw, eps=1e-5):
    w1, b1, w2, gamma, beta, w3 = params
    N, Cin, H, W = x_nchw.shape
    x = x_nchw.reshape(N, Cin, H * W).astype(jnp.float32)
    lrelu = lambda v: jnp.where(v >= 0, v, 0.2 * v)

    h = lrelu(jnp.einsum("oc,ncp->nop", w1, x) + b1[None, :, None])
    z = jnp.einsum("oc,ncp->nop", w2, h)
    mean = jnp.mean(z, axis=(0, 2))
    var = jnp.mean(z * z, axis=(0, 2)) - mean * mean
    zn = (z - mean[None, :, None]) * jax.lax.rsqrt(var + eps)[None, :, None]
    zn = lrelu(zn * gamma[None, :, None] + beta[None, :, None])
    out = jnp.einsum("oc,ncp->nop", w3, zn)
    return out.reshape(N, 1, H, W)


if __name__ == "__main__":
    key = jax.random.PRNGKey(0)
    input_nc, ndf = 4, 64
    params = init_params(key, input_nc, ndf)
    # small NCHW input consistent with the module: batch=2, channels=4, spatial=16
    x = jax.random.normal(jax.random.fold_in(key, 99),
                          (2, input_nc, 16, 16), jnp.float32)

    fwd = jax.jit(pixel_discriminator_forward)
    out = jax.block_until_ready(fwd(params, x))

    ref = _ref_forward(params, x)
    assert out.shape == ref.shape == (2, 1, 16, 16), (out.shape, ref.shape)
    err = float(jnp.max(jnp.abs(out - ref)))
    scale = float(jnp.max(jnp.abs(ref))) + 1.0
    # kernel runs the conv2 matmul in bf16 (f32 accumulation); reference is pure f32
    assert err <= 5e-2 * scale, (err, scale)

    print("KERNEL_OK")
</pallas_src>

<mosaic_0001>
module attributes {stable_mosaic.version = 11 : i64} {
  func.func @_stats_kernel(%arg0: i32, %arg1: i32, %arg2: i32, %arg3: memref<1x4x256xf32, #tpu.memory_space<vmem>>, %arg4: memref<4x64x1xf32, #tpu.memory_space<vmem>>, %arg5: memref<64x1xf32, #tpu.memory_space<vmem>>, %arg6: memref<128x64xbf16, #tpu.memory_space<vmem>>, %arg7: memref<1x1x128x2xf32, #tpu.memory_space<vmem>>, %arg8: memref<128x128xf32, #tpu.memory_space<vmem>>, %arg9: memref<128x128xf32, #tpu.memory_space<vmem>>) attributes {dimension_semantics = [#tpu.dimension_semantics<parallel>, #tpu.dimension_semantics<parallel>, #tpu.dimension_semantics<arbitrary>], iteration_bounds = array<i64: 2, 1, 1>, scalar_prefetch = 0 : i64, scratch_operands = 2 : i64, tpu.core_type = #tpu.core_type<tc>, window_params = [{transform_indices = @transform_0, window_bounds = array<i64: 1, 4, 256>}, {pipeline_mode = #tpu.pipeline_mode<synchronous>, transform_indices = @transform_1, window_bounds = array<i64: 4, 64, 1>}, {pipeline_mode = #tpu.pipeline_mode<synchronous>, transform_indices = @transform_2, window_bounds = array<i64: 64, 1>}, {pipeline_mode = #tpu.pipeline_mode<synchronous>, transform_indices = @transform_3, window_bounds = array<i64: 128, 64>}, {transform_indices = @transform_4, window_bounds = array<i64: 1, 1, 128, 2>}]} {
    %c0_i32 = arith.constant 0 : i32
    %0 = arith.cmpi eq, %arg2, %c0_i32 : i32
    %1 = arith.extui %0 : i1 to i32
    %c0_i32_0 = arith.constant 0 : i32
    %2 = arith.cmpi ne, %1, %c0_i32_0 : i32
    scf.if %2 {
      %cst_27 = arith.constant 0.000000e+00 : f32
      %57 = vector.broadcast %cst_27 : f32 to vector<128x128xf32>
      %c0_28 = arith.constant 0 : index
      %c0_29 = arith.constant 0 : index
      %58 = vector.load %arg8[%c0_28, %c0_29] : memref<128x128xf32, #tpu.memory_space<vmem>>, vector<128x128xf32>
      tpu.vector_store %arg8[%c0_28, %c0_29], %57 {strides = array<i32>} : memref<128x128xf32, #tpu.memory_space<vmem>>, vector<128x128xf32>,
      %cst_30 = arith.constant 0.000000e+00 : f32
      %59 = vector.broadcast %cst_30 : f32 to vector<128x128xf32>
      %c0_31 = arith.constant 0 : index
      %c0_32 = arith.constant 0 : index
      %60 = vector.load %arg9[%c0_31, %c0_32] : memref<128x128xf32, #tpu.memory_space<vmem>>, vector<128x128xf32>
      tpu.vector_store %arg9[%c0_31, %c0_32], %59 {strides = array<i32>} : memref<128x128xf32, #tpu.memory_space<vmem>>, vector<128x128xf32>,
    } else {
    }
    %c0 = arith.constant 0 : index
    %c0_1 = arith.constant 0 : index
    %c0_2 = arith.constant 0 : index
    %3 = vector.load %arg3[%c0, %c0_1, %c0_2] : memref<1x4x256xf32, #tpu.memory_space<vmem>>, vector<1x4x256xf32>
    %4 = vector.shape_cast %3 : vector<1x4x256xf32> to vector<4x256xf32>
    %c0_3 = arith.constant 0 : index
    %c0_4 = arith.constant 0 : index
    %c0_5 = arith.constant 0 : index
    %5 = vector.load %arg4[%c0_3, %c0_4, %c0_5] : memref<4x64x1xf32, #tpu.memory_space<vmem>>, vector<1x64x1xf32>
    %6 = vector.shape_cast %5 : vector<1x64x1xf32> to vector<64x1xf32>
    %7 = vector.extract_strided_slice %4 {offsets = [0, 0], sizes = [1, 256], strides = [1, 1]} : vector<4x256xf32> to vector<1x256xf32>
    %8 = vector.broadcast %6 : vector<64x1xf32> to vector<64x256xf32>
    %9 = vector.broadcast %7 : vector<1x256xf32> to vector<64x256xf32>
    %10 = arith.mulf %8, %9 : vector<64x256xf32>
    %c1 = arith.constant 1 : index
    %c0_6 = arith.constant 0 : index
    %c0_7 = arith.constant 0 : index
    %11 = vector.load %arg4[%c1, %c0_6, %c0_7] : memref<4x64x1xf32, #tpu.memory_space<vmem>>, vector<1x64x1xf32>
    %12 = vector.shape_cast %11 : vector<1x64x1xf32> to vector<64x1xf32>
    %13 = vector.extract_strided_slice %4 {offsets = [1, 0], sizes = [1, 256], strides = [1, 1]} : vector<4x256xf32> to vector<1x256xf32>
    %14 = vector.broadcast %12 : vector<64x1xf32> to vector<64x256xf32>
    %15 = vector.broadcast %13 : vector<1x256xf32> to vector<64x256xf32>
    %16 = arith.mulf %14, %15 : vector<64x256xf32>
    %17 = arith.addf %10, %16 : vector<64x256xf32>
    %c2 = arith.constant 2 : index
    %c0_8 = arith.constant 0 : index
    %c0_9 = arith.constant 0 : index
    %18 = vector.load %arg4[%c2, %c0_8, %c0_9] : memref<4x64x1xf32, #tpu.memory_space<vmem>>, vector<1x64x1xf32>
    %19 = vector.shape_cast %18 : vector<1x64x1xf32> to vector<64x1xf32>
    %20 = vector.extract_strided_slice %4 {offsets = [2, 0], sizes = [1, 256], strides = [1, 1]} : vector<4x256xf32> to vector<1x256xf32>
    %21 = vector.broadcast %19 : vector<64x1xf32> to vector<64x256xf32>
    %22 = vector.broadcast %20 : vector<1x256xf32> to vector<64x256xf32>
    %23 = arith.mulf %21, %22 : vector<64x256xf32>
    %24 = arith.addf %17, %23 : vector<64x256xf32>
    %c3 = arith.constant 3 : index
    %c0_10 = arith.constant 0 : index
    %c0_11 = arith.constant 0 : index
    %25 = vector.load %arg4[%c3, %c0_10, %c0_11] : memref<4x64x1xf32, #tpu.memory_space<vmem>>, vector<1x64x1xf32>
    %26 = vector.shape_cast %25 : vector<1x64x1xf32> to vector<64x1xf32>
    %27 = vector.extract_strided_slice %4 {offsets = [3, 0], sizes = [1, 256], strides = [1, 1]} : vector<4x256xf32> to vector<1x256xf32>
    %28 = vector.broadcast %26 : vector<64x1xf32> to vector<64x256xf32>
    %29 = vector.broadcast %27 : vector<1x256xf32> to vector<64x256xf32>
    %30 = arith.mulf %28, %29 : vector<64x256xf32>
    %31 = arith.addf %24, %30 : vector<64x256xf32>
    %c0_12 = arith.constant 0 : index
    %c0_13 = arith.constant 0 : index
    %32 = vector.load %arg5[%c0_12, %c0_13] : memref<64x1xf32, #tpu.memory_space<vmem>>, vector<64x1xf32>
    %33 = vector.broadcast %32 : vector<64x1xf32> to vector<64x256xf32>
    %34 = arith.addf %31, %33 : vector<64x256xf32>
    %cst = arith.constant 2.000000e-01 : f32
    %35 = vector.broadcast %cst : f32 to vector<64x256xf32>
    %36 = arith.mulf %35, %34 : vector<64x256xf32>
    %37 = arith.maximumf %34, %36 : vector<64x256xf32>
    %38 = arith.truncf %37 : vector<64x256xf32> to vector<64x256xbf16>
    %c0_14 = arith.constant 0 : index
    %c0_15 = arith.constant 0 : index
    %39 = vector.load %arg6[%c0_14, %c0_15] : memref<128x64xbf16, #tpu.memory_space<vmem>>, vector<128x64xbf16>
    %cst_16 = arith.constant dense<0.000000e+00> : vector<128x256xf32>
    %40 = tpu.matmul %39, %38, %cst_16 {dimension_numbers = #tpu.dot_dimension_numbers<[1], [0], [0], [1], [0, 0, 1, 1], [], []>} : vector<128x64xbf16>, vector<64x256xbf16>, vector<128x256xf32> -> vector<128x256xf32>
    %41 = arith.mulf %40, %40 : vector<128x256xf32>
    %42 = vector.extract_strided_slice %40 {offsets = [0, 0], sizes = [128, 128], strides = [1, 1]} : vector<128x256xf32> to vector<128x128xf32>
    %43 = vector.extract_strided_slice %41 {offsets = [0, 0], sizes = [128, 128], strides = [1, 1]} : vector<128x256xf32> to vector<128x128xf32>
    %44 = vector.extract_strided_slice %40 {offsets = [0, 128], sizes = [128, 128], strides = [1, 1]} : vector<128x256xf32> to vector<128x128xf32>
    %45 = arith.addf %42, %44 : vector<128x128xf32>
    %46 = vector.extract_strided_slice %41 {offsets = [0, 128], sizes = [128, 128], strides = [1, 1]} : vector<128x256xf32> to vector<128x128xf32>
    %47 = arith.addf %43, %46 : vector<128x128xf32>
    %c0_17 = arith.constant 0 : index
    %c0_18 = arith.constant 0 : index
    %48 = vector.load %arg8[%c0_17, %c0_18] : memref<128x128xf32, #tpu.memory_space<vmem>>, vector<128x128xf32>
    %49 = arith.addf %48, %45 : vector<128x128xf32>
    %c0_19 = arith.constant 0 : index
    %c0_20 = arith.constant 0 : index
    %50 = vector.load %arg8[%c0_19, %c0_20] : memref<128x128xf32, #tpu.memory_space<vmem>>, vector<128x128xf32>
    tpu.vector_store %arg8[%c0_19, %c0_20], %49 {strides = array<i32>} : memref<128x128xf32, #tpu.memory_space<vmem>>, vector<128x128xf32>,
    %c0_21 = arith.constant 0 : index
    %c0_22 = arith.constant 0 : index
    %51 = vector.load %arg9[%c0_21, %c0_22] : memref<128x128xf32, #tpu.memory_space<vmem>>, vector<128x128xf32>
    %52 = arith.addf %51, %47 : vector<128x128xf32>
    %c0_23 = arith.constant 0 : index
    %c0_24 = arith.constant 0 : index
    %53 = vector.load %arg9[%c0_23, %c0_24] : memref<128x128xf32, #tpu.memory_space<vmem>>, vector<128x128xf32>
    tpu.vector_store %arg9[%c0_23, %c0_24], %52 {strides = array<i32>} : memref<128x128xf32, #tpu.memory_space<vmem>>, vector<128x128xf32>,
    %c0_i32_25 = arith.constant 0 : i32
    %54 = arith.cmpi eq, %arg2, %c0_i32_25 : i32
    %55 = arith.extui %54 : i1 to i32
    %c0_i32_26 = arith.constant 0 : i32
    %56 = arith.cmpi ne, %55, %c0_i32_26 : i32
    scf.if %56 {
      %c0_27 = arith.constant 0 : index
      %c0_28 = arith.constant 0 : index
      %57 = vector.load %arg8[%c0_27, %c0_28] : memref<128x128xf32, #tpu.memory_space<vmem>>, vector<128x128xf32>
      %cst_29 = arith.constant dense<0.000000e+00> : vector<128xf32>
      %58 = vector.multi_reduction <add>, %57, %cst_29 [1] : vector<128x128xf32> to vector<128xf32>
      %59 = vector.shape_cast %58 : vector<128xf32> to vector<128x1xf32>
      %c0_30 = arith.constant 0 : index
      %c0_31 = arith.constant 0 : index
      %c0_32 = arith.constant 0 : index
      %c0_33 = arith.constant 0 : index
      %60 = vector.load %arg7[%c0_30, %c0_31, %c0_32, %c0_33] : memref<1x1x128x2xf32, #tpu.memory_space<vmem>>, vector<1x1x128x1xf32>
      %61 = vector.shape_cast %60 : vector<1x1x128x1xf32> to vector<128x1xf32>
      %62 = vector.shape_cast %59 : vector<128x1xf32> to vector<1x1x128x1xf32>
      tpu.vector_store %arg7[%c0_30, %c0_31, %c0_32, %c0_33], %62 {strides = array<i32>} : memref<1x1x128x2xf32, #tpu.memory_space<vmem>>, vector<1x1x128x1xf32>,
      %c0_34 = arith.constant 0 : index
      %c0_35 = arith.constant 0 : index
      %63 = vector.load %arg9[%c0_34, %c0_35] : memref<128x128xf32, #tpu.memory_space<vmem>>, vector<128x128xf32>
      %cst_36 = arith.constant dense<0.000000e+00> : vector<128xf32>
      %64 = vector.multi_reduction <add>, %63, %cst_36 [1] : vector<128x128xf32> to vector<128xf32>
      %65 = vector.shape_cast %64 : vector<128xf32> to vector<128x1xf32>
      %c0_37 = arith.constant 0 : index
      %c0_38 = arith.constant 0 : index
      %c0_39 = arith.constant 0 : index
      %c1_40 = arith.constant 1 : index
      %66 = vector.load %arg7[%c0_37, %c0_38, %c0_39, %c1_40] : memref<1x1x128x2xf32, #tpu.memory_space<vmem>>, vector<1x1x128x1xf32>
      %67 = vector.shape_cast %66 : vector<1x1x128x1xf32> to vector<128x1xf32>
      %68 = vector.shape_cast %65 : vector<128x1xf32> to vector<1x1x128x1xf32>
      tpu.vector_store %arg7[%c0_37, %c0_38, %c0_39, %c1_40], %68 {strides = array<i32>} : memref<1x1x128x2xf32, #tpu.memory_space<vmem>>, vector<1x1x128x1xf32>,
    } else {
    }
    return
  }
  func.func @transform_0(%arg0: i32, %arg1: i32, %arg2: i32) -> (i32, i32, i32) {
    %c1_i32 = arith.constant 1 : i32
    %0 = arith.muli %arg1, %c1_i32 : i32
    %1 = arith.addi %0, %arg2 : i32
    %c0_i32 = arith.constant 0 : i32
    %c0_i32_0 = arith.constant 0 : i32
    return %arg0, %c0_i32, %1 : i32, i32, i32
  }
  func.func @transform_1(%arg0: i32, %arg1: i32, %arg2: i32) -> (i32, i32, i32) {
    %c0_i32 = arith.constant 0 : i32
    %c0_i32_0 = arith.constant 0 : i32
    %c0_i32_1 = arith.constant 0 : i32
    %c0_i32_2 = arith.constant 0 : i32
    return %c0_i32, %c0_i32_0, %c0_i32_1 : i32, i32, i32
  }
  func.func @transform_2(%arg0: i32, %arg1: i32, %arg2: i32) -> (i32, i32) {
    %c0_i32 = arith.constant 0 : i32
    %c0_i32_0 = arith.constant 0 : i32
    %c0_i32_1 = arith.constant 0 : i32
    return %c0_i32, %c0_i32_0 : i32, i32
  }
  func.func @transform_3(%arg0: i32, %arg1: i32, %arg2: i32) -> (i32, i32) {
    %c0_i32 = arith.constant 0 : i32
    %c0_i32_0 = arith.constant 0 : i32
    %c0_i32_1 = arith.constant 0 : i32
    return %c0_i32, %c0_i32_0 : i32, i32
  }
  func.func @transform_4(%arg0: i32, %arg1: i32, %arg2: i32) -> (i32, i32, i32, i32) {
    %c0_i32 = arith.constant 0 : i32
    %c0_i32_0 = arith.constant 0 : i32
    %c0_i32_1 = arith.constant 0 : i32
    return %arg0, %arg1, %c0_i32, %c0_i32_0 : i32, i32, i32, i32
  }
}

module attributes {stable_mosaic.version = 11 : i64} {
  func.func @_apply_kernel(%arg0: i32, %arg1: i32, %arg2: memref<1x4x256xf32, #tpu.memory_space<vmem>>, %arg3: memref<4x64x1xf32, #tpu.memory_space<vmem>>, %arg4: memref<64x1xf32, #tpu.memory_space<vmem>>, %arg5: memref<128x64xbf16, #tpu.memory_space<vmem>>, %arg6: memref<128x1xf32, #tpu.memory_space<vmem>>, %arg7: memref<128x1xf32, #tpu.memory_space<vmem>>, %arg8: memref<128x1xf32, #tpu.memory_space<vmem>>, %arg9: memref<1x1x256xf32, #tpu.memory_space<vmem>>) attributes {dimension_semantics = [#tpu.dimension_semantics<parallel>, #tpu.dimension_semantics<parallel>], iteration_bounds = array<i64: 2, 1>, scalar_prefetch = 0 : i64, scratch_operands = 0 : i64, tpu.core_type = #tpu.core_type<tc>, window_params = [{transform_indices = @transform_0, window_bounds = array<i64: 1, 4, 256>}, {pipeline_mode = #tpu.pipeline_mode<synchronous>, transform_indices = @transform_1, window_bounds = array<i64: 4, 64, 1>}, {pipeline_mode = #tpu.pipeline_mode<synchronous>, transform_indices = @transform_2, window_bounds = array<i64: 64, 1>}, {pipeline_mode = #tpu.pipeline_mode<synchronous>, transform_indices = @transform_3, window_bounds = array<i64: 128, 64>}, {pipeline_mode = #tpu.pipeline_mode<synchronous>, transform_indices = @transform_4, window_bounds = array<i64: 128, 1>}, {pipeline_mode = #tpu.pipeline_mode<synchronous>, transform_indices = @transform_5, window_bounds = array<i64: 128, 1>}, {pipeline_mode = #tpu.pipeline_mode<synchronous>, transform_indices = @transform_6, window_bounds = array<i64: 128, 1>}, {transform_indices = @transform_7, window_bounds = array<i64: 1, 1, 256>}]} {
    %c0 = arith.constant 0 : index
    %c0_0 = arith.constant 0 : index
    %c0_1 = arith.constant 0 : index
    %0 = vector.load %arg2[%c0, %c0_0, %c0_1] : memref<1x4x256xf32, #tpu.memory_space<vmem>>, vector<1x4x256xf32>
    %1 = vector.shape_cast %0 : vector<1x4x256xf32> to vector<4x256xf32>
    %c0_2 = arith.constant 0 : index
    %c0_3 = arith.constant 0 : index
    %c0_4 = arith.constant 0 : index
    %2 = vector.load %arg3[%c0_2, %c0_3, %c0_4] : memref<4x64x1xf32, #tpu.memory_space<vmem>>, vector<1x64x1xf32>
    %3 = vector.shape_cast %2 : vector<1x64x1xf32> to vector<64x1xf32>
    %4 = vector.extract_strided_slice %1 {offsets = [0, 0], sizes = [1, 256], strides = [1, 1]} : vector<4x256xf32> to vector<1x256xf32>
    %5 = vector.broadcast %3 : vector<64x1xf32> to vector<64x256xf32>
    %6 = vector.broadcast %4 : vector<1x256xf32> to vector<64x256xf32>
    %7 = arith.mulf %5, %6 : vector<64x256xf32>
    %c1 = arith.constant 1 : index
    %c0_5 = arith.constant 0 : index
    %c0_6 = arith.constant 0 : index
    %8 = vector.load %arg3[%c1, %c0_5, %c0_6] : memref<4x64x1xf32, #tpu.memory_space<vmem>>, vector<1x64x1xf32>
    %9 = vector.shape_cast %8 : vector<1x64x1xf32> to vector<64x1xf32>
    %10 = vector.extract_strided_slice %1 {offsets = [1, 0], sizes = [1, 256], strides = [1, 1]} : vector<4x256xf32> to vector<1x256xf32>
    %11 = vector.broadcast %9 : vector<64x1xf32> to vector<64x256xf32>
    %12 = vector.broadcast %10 : vector<1x256xf32> to vector<64x256xf32>
    %13 = arith.mulf %11, %12 : vector<64x256xf32>
    %14 = arith.addf %7, %13 : vector<64x256xf32>
    %c2 = arith.constant 2 : index
    %c0_7 = arith.constant 0 : index
    %c0_8 = arith.constant 0 : index
    %15 = vector.load %arg3[%c2, %c0_7, %c0_8] : memref<4x64x1xf32, #tpu.memory_space<vmem>>, vector<1x64x1xf32>
    %16 = vector.shape_cast %15 : vector<1x64x1xf32> to vector<64x1xf32>
    %17 = vector.extract_strided_slice %1 {offsets = [2, 0], sizes = [1, 256], strides = [1, 1]} : vector<4x256xf32> to vector<1x256xf32>
    %18 = vector.broadcast %16 : vector<64x1xf32> to vector<64x256xf32>
    %19 = vector.broadcast %17 : vector<1x256xf32> to vector<64x256xf32>
    %20 = arith.mulf %18, %19 : vector<64x256xf32>
    %21 = arith.addf %14, %20 : vector<64x256xf32>
    %c3 = arith.constant 3 : index
    %c0_9 = arith.constant 0 : index
    %c0_10 = arith.constant 0 : index
    %22 = vector.load %arg3[%c3, %c0_9, %c0_10] : memref<4x64x1xf32, #tpu.memory_space<vmem>>, vector<1x64x1xf32>
    %23 = vector.shape_cast %22 : vector<1x64x1xf32> to vector<64x1xf32>
    %24 = vector.extract_strided_slice %1 {offsets = [3, 0], sizes = [1, 256], strides = [1, 1]} : vector<4x256xf32> to vector<1x256xf32>
    %25 = vector.broadcast %23 : vector<64x1xf32> to vector<64x256xf32>
    %26 = vector.broadcast %24 : vector<1x256xf32> to vector<64x256xf32>
    %27 = arith.mulf %25, %26 : vector<64x256xf32>
    %28 = arith.addf %21, %27 : vector<64x256xf32>
    %c0_11 = arith.constant 0 : index
    %c0_12 = arith.constant 0 : index
    %29 = vector.load %arg4[%c0_11, %c0_12] : memref<64x1xf32, #tpu.memory_space<vmem>>, vector<64x1xf32>
    %30 = vector.broadcast %29 : vector<64x1xf32> to vector<64x256xf32>
    %31 = arith.addf %28, %30 : vector<64x256xf32>
    %cst = arith.constant 2.000000e-01 : f32
    %32 = vector.broadcast %cst : f32 to vector<64x256xf32>
    %33 = arith.mulf %32, %31 : vector<64x256xf32>
    %34 = arith.maximumf %31, %33 : vector<64x256xf32>
    %35 = arith.truncf %34 : vector<64x256xf32> to vector<64x256xbf16>
    %c0_13 = arith.constant 0 : index
    %c0_14 = arith.constant 0 : index
    %36 = vector.load %arg5[%c0_13, %c0_14] : memref<128x64xbf16, #tpu.memory_space<vmem>>, vector<128x64xbf16>
    %cst_15 = arith.constant dense<0.000000e+00> : vector<128x256xf32>
    %37 = tpu.matmul %36, %35, %cst_15 {dimension_numbers = #tpu.dot_dimension_numbers<[1], [0], [0], [1], [0, 0, 1, 1], [], []>} : vector<128x64xbf16>, vector<64x256xbf16>, vector<128x256xf32> -> vector<128x256xf32>
    %c0_16 = arith.constant 0 : index
    %c0_17 = arith.constant 0 : index
    %38 = vector.load %arg6[%c0_16, %c0_17] : memref<128x1xf32, #tpu.memory_space<vmem>>, vector<128x1xf32>
    %39 = vector.broadcast %38 : vector<128x1xf32> to vector<128x256xf32>
    %40 = arith.mulf %37, %39 : vector<128x256xf32>
    %c0_18 = arith.constant 0 : index
    %c0_19 = arith.constant 0 : index
    %41 = vector.load %arg7[%c0_18, %c0_19] : memref<128x1xf32, #tpu.memory_space<vmem>>, vector<128x1xf32>
    %42 = vector.broadcast %41 : vector<128x1xf32> to vector<128x256xf32>
    %43 = arith.addf %40, %42 : vector<128x256xf32>
    %cst_20 = arith.constant 2.000000e-01 : f32
    %44 = vector.broadcast %cst_20 : f32 to vector<128x256xf32>
    %45 = arith.mulf %44, %43 : vector<128x256xf32>
    %46 = arith.maximumf %43, %45 : vector<128x256xf32>
    %c0_21 = arith.constant 0 : index
    %c0_22 = arith.constant 0 : index
    %47 = vector.load %arg8[%c0_21, %c0_22] : memref<128x1xf32, #tpu.memory_space<vmem>>, vector<128x1xf32>
    %48 = vector.broadcast %47 : vector<128x1xf32> to vector<128x256xf32>
    %49 = arith.mulf %48, %46 : vector<128x256xf32>
    %cst_23 = arith.constant dense<0.000000e+00> : vector<256xf32>
    %50 = vector.multi_reduction <add>, %49, %cst_23 [0] : vector<128x256xf32> to vector<256xf32>
    %51 = vector.shape_cast %50 : vector<256xf32> to vector<1x256xf32>
    %c0_24 = arith.constant 0 : index
    %c0_25 = arith.constant 0 : index
    %c0_26 = arith.constant 0 : index
    %52 = vector.load %arg9[%c0_24, %c0_25, %c0_26] : memref<1x1x256xf32, #tpu.memory_space<vmem>>, vector<1x1x256xf32>
    %53 = vector.shape_cast %52 : vector<1x1x256xf32> to vector<1x256xf32>
    %54 = vector.shape_cast %51 : vector<1x256xf32> to vector<1x1x256xf32>
    tpu.vector_store %arg9[%c0_24, %c0_25, %c0_26], %54 {strides = array<i32>} : memref<1x1x256xf32, #tpu.memory_space<vmem>>, vector<1x1x256xf32>,
    return
  }
  func.func @transform_0(%arg0: i32, %arg1: i32) -> (i32, i32, i32) {
    %c0_i32 = arith.constant 0 : i32
    %c0_i32_0 = arith.constant 0 : i32
    return %arg0, %c0_i32, %arg1 : i32, i32, i32
  }
  func.func @transform_1(%arg0: i32, %arg1: i32) -> (i32, i32, i32) {
    %c0_i32 = arith.constant 0 : i32
    %c0_i32_0 = arith.constant 0 : i32
    %c0_i32_1 = arith.constant 0 : i32
    %c0_i32_2 = arith.constant 0 : i32
    return %c0_i32, %c0_i32_0, %c0_i32_1 : i32, i32, i32
  }
  func.func @transform_2(%arg0: i32, %arg1: i32) -> (i32, i32) {
    %c0_i32 = arith.constant 0 : i32
    %c0_i32_0 = arith.constant 0 : i32
    %c0_i32_1 = arith.constant 0 : i32
    return %c0_i32, %c0_i32_0 : i32, i32
  }
  func.func @transform_3(%arg0: i32, %arg1: i32) -> (i32, i32) {
    %c0_i32 = arith.constant 0 : i32
    %c0_i32_0 = arith.constant 0 : i32
    %c0_i32_1 = arith.constant 0 : i32
    return %c0_i32, %c0_i32_0 : i32, i32
  }
  func.func @transform_4(%arg0: i32, %arg1: i32) -> (i32, i32) {
    %c0_i32 = arith.constant 0 : i32
    %c0_i32_0 = arith.constant 0 : i32
    %c0_i32_1 = arith.constant 0 : i32
    return %c0_i32, %c0_i32_0 : i32, i32
  }
  func.func @transform_5(%arg0: i32, %arg1: i32) -> (i32, i32) {
    %c0_i32 = arith.constant 0 : i32
    %c0_i32_0 = arith.constant 0 : i32
    %c0_i32_1 = arith.constant 0 : i32
    return %c0_i32, %c0_i32_0 : i32, i32
  }
  func.func @transform_6(%arg0: i32, %arg1: i32) -> (i32, i32) {
    %c0_i32 = arith.constant 0 : i32
    %c0_i32_0 = arith.constant 0 : i32
    %c0_i32_1 = arith.constant 0 : i32
    return %c0_i32, %c0_i32_0 : i32, i32
  }
  func.func @transform_7(%arg0: i32, %arg1: i32) -> (i32, i32, i32) {
    %c0_i32 = arith.constant 0 : i32
    %c0_i32_0 = arith.constant 0 : i32
    return %arg0, %c0_i32, %arg1 : i32, i32, i32
  }
}

</mosaic_0001>

<bundles_post_ra>
// kernel: pixel_discriminator_forward.2
= control target key start
LH: loop header
LB: loop body
LE: loop exit
PB: predicated region body
PF: predicated region fallthrough
CT: control target
= control target key end

     0   :  { %s1497_s15 = smov 0   ;;  %s1499_s16 = smov 0   ;;  %s1894_s0 = inlined_call_operand.vmem [shape: f32[2,4,256], index: 0, kind: input, shape index: {}]   ;;  %s1895_s1 = inlined_call_operand.vmem [shape: f32[4,64,1], index: 1, kind: input, shape index: {}]   ;;  %s1896_s2 = inlined_call_operand.vmem [shape: f32[64,1], index: 2, kind: input, shape index: {}]   ;;  %s1897_s3 = inlined_call_operand.vmem [shape: bf16[128,64], index: 3, kind: input, shape index: {}]   ;;  %s1898_s4 = inlined_call_operand.vmem [shape: f32[2,1,128,2], index: 4, kind: output, shape index: {}]  }
   0x1   :  { %s1501_s17 = smov 0  }
   0x2 LB: > { %s33_s18 = sadd.s32 1, %s1465_s16  ;;  %p1355_p0 = scmp.ge.s32.totalorder %s1469_s17, 1  ;;  %s1469_s17 = sphi %s1501_s17, %s14_s17   ;;  %s1465_s16 = sphi %s1499_s16, %s1900_s16   ;;  %s1461_s15 = sphi %s1497_s15, %s1899_s15  }
   0x3   : > { %p35_p1 = scmp.ge.s32.totalorder %s33_s18, 2  ;;  %p194_p2 = scmp.lt.s32.totalorder %s1469_s17, 3 }
   0x5   : > { %s1902_s18 = smov (%p35_p1, %s33_s18), 0  ;;  %p195_p3 = pnand %p1355_p0, %p194_p2 }
   0x6   : > { %v1360_v0 = vld [vmem:[%s1895_s1 + $0x40] sm:$0xff] (!%p195_p3)  ;;  %v1471_v2 = vmov (!%p195_p3), 0   ;;  %v1361_v3 = vld [vmem:[%s1895_s1 + $0x48] sm:$0xff] (!%p195_p3)  ;;  %v291_v7 = vld [vmem:[%s1895_s1 + $0x18] sm:$0xff] (!%p195_p3)  ;;  %p231_p4 = scmp.lt.s32.totalorder (!%p195_p3), %s1461_s15, 1  ;;  %v337_v47 = vlaneseq (!%p195_p3)  ;;  %vm828_vm0 = vcmask (!%p195_p3), 523264  }
   0x7   : > { %198 = sbr.rel (%p195_p3) target bundleno = 647 (0x287), region = 36  ;;  %v288_v1 = vld [vmem:[%s1895_s1] sm:$0xff] (!%p195_p3)  ;;  %1438 = vset.pattern.permute.xlu1 (!%p195_p3), %v1471_v2  ;;  %1437 = vset.pattern.permute.xlu0 (!%p195_p3), %v1471_v2  ;;  %v289_v4 = vld [vmem:[%s1895_s1 + $0x8] sm:$0xff] (!%p195_p3)  ;;  %v290_v8 = vld [vmem:[%s1895_s1 + $0x10] sm:$0xff] (!%p195_p3)  ;;  %vm1177_vm1 = vcmask (!%p195_p3), 7168   ;;  %vm1242_vm2 = vcmask (!%p195_p3), 15368  }
   0x8   : > { %382 = vperm.xlu1 (!%p195_p3), %1438, %v1360_v0   ;;  %298 = vperm.xlu0 (!%p195_p3), %1437, %v288_v1   ;;  %v1369_v5 = vld [vmem:[%s1895_s1 + $0x88] sm:$0xff] (!%p195_p3)  ;;  %v1368_v6 = vld [vmem:[%s1895_s1 + $0x80] sm:$0xff] (!%p195_p3)  ;;  %v1363_v9 = vld [vmem:[%s1895_s1 + $0x58] sm:$0xff] (!%p195_p3)  ;;  %v338_v50 = vshrl.u32 (!%p195_p3), %v337_v47, 7 }
   0x9   : > { %885 = vmatprep.mubr.bf16.mxu0 (!%p195_p3), %v1471_v2  ;;  %925 = vmatprep.mubr.bf16.mxu1 (!%p195_p3), %v1471_v2  ;;  %v1362_v10 = vld [vmem:[%s1895_s1 + $0x50] sm:$0xff] (!%p195_p3)  ;;  %v1377_v11 = vld [vmem:[%s1895_s1 + $0xc8] sm:$0xff] (!%p195_p3)  ;;  %v1376_v12 = vld [vmem:[%s1895_s1 + $0xc0] sm:$0xff] (!%p195_p3) }
   0xa   : > { %v1371_v13 = vld [vmem:[%s1895_s1 + $0x98] sm:$0xff] (!%p195_p3)  ;;  %v1370_v14 = vld [vmem:[%s1895_s1 + $0x90] sm:$0xff] (!%p195_p3)  ;;  %v293_v15 = vld [vmem:[%s1895_s1 + $0x28] sm:$0xff] (!%p195_p3)  ;;  %v422_v53 = vsub.s32 (!%p195_p3), 1, %v338_v50  ;;  %v426_v54 = vsub.s32 (!%p195_p3), 5, %v338_v50  ;;  %v339_v55 = vsub.s32 (!%p195_p3), 0, %v338_v50 }
   0xb   : > { %v292_v16 = vld [vmem:[%s1895_s1 + $0x20] sm:$0xff] (!%p195_p3)  ;;  %v1365_v17 = vld [vmem:[%s1895_s1 + $0x68] sm:$0xff] (!%p195_p3)  ;;  %v1379_v19 = vld [vmem:[%s1895_s1 + $0xd8] sm:$0xff] (!%p195_p3)  ;;  %v343_v56 = vsub.s32 (!%p195_p3), 4, %v338_v50  ;;  %v521_v58 = vsub.s32 (!%p195_p3), 2, %v338_v50  ;;  %v525_v59 = vsub.s32 (!%p195_p3), 6, %v338_v50 }
   0xc   : > { %387 = vperm.xlu1 (!%p195_p3), %1438, %v1361_v3   ;;  %303 = vperm.xlu0 (!%p195_p3), %1437, %v289_v4   ;;  %v1364_v18 = vld [vmem:[%s1895_s1 + $0x60] sm:$0xff] (!%p195_p3)  ;;  %v1378_v20 = vld [vmem:[%s1895_s1 + $0xd0] sm:$0xff] (!%p195_p3)  ;;  %v669_v21 = vld [vmem:[%s1896_s2 + $0x8] sm:$0xff] (!%p195_p3)  ;;  %v620_v3 = vsub.s32 (!%p195_p3), 3, %v338_v50  ;;  %v624_v4 = vsub.s32 (!%p195_p3), 7, %v338_v50 }
   0xd   : > { %v668_v22 = vld [vmem:[%s1896_s2] sm:$0xff] (!%p195_p3)  ;;  %v1373_v23 = vld [vmem:[%s1895_s1 + $0xa8] sm:$0xff] (!%p195_p3)  ;;  %v295_v25 = vld [vmem:[%s1895_s1 + $0x38] sm:$0xff] (!%p195_p3) }
   0xe   : > { %v1372_v24 = vld [vmem:[%s1895_s1 + $0xa0] sm:$0xff]  ;;  %v294_v26 = vld [vmem:[%s1895_s1 + $0x30] sm:$0xff]  ;;  %v1367_v27 = vld [vmem:[%s1895_s1 + $0x78] sm:$0xff]  ;;  %s1904_s15 = smov (!%p231_p4, %s1461_s15), 1 }
   0xf   : > { %v1366_v28 = vld [vmem:[%s1895_s1 + $0x70] sm:$0xff]  ;;  %v1381_v29 = vld [vmem:[%s1895_s1 + $0xe8] sm:$0xff]  ;;  %v1380_v30 = vld [vmem:[%s1895_s1 + $0xe0] sm:$0xff]  ;;  %s1402_s7 = sshll.u32 %s1904_s15, 3  ;;  %s1403_s5 = sshll.u32 %s1904_s15, 7 }
  0x10   : > { %486 = vperm.xlu1 %1438, %v1369_v5   ;;  %481 = vperm.xlu0 %1437, %v1368_v6   ;;  %v671_v31 = vld [vmem:[%s1896_s2 + $0x18] sm:$0xff]  ;;  %v670_v32 = vld [vmem:[%s1896_s2 + $0x10] sm:$0xff]  ;;  %v673_v37 = vld [vmem:[%s1896_s2 + $0x28] sm:$0xff]  ;;  %s238_s10 = scalar_lea.vmem %s1894_s0, %s1402_s7  ;;  %s1819_s8 = scalar_lea.vmem %s1898_s4, %s1403_s5 }
  0x11   : > { %v1375_v33 = vld [vmem:[%s1895_s1 + $0xb8] sm:$0xff]  ;;  %v1374_v34 = vld [vmem:[%s1895_s1 + $0xb0] sm:$0xff]  ;;  %v672_v38 = vld [vmem:[%s1896_s2 + $0x20] sm:$0xff] }
  0x12   : > { %v1383_v35 = vld [vmem:[%s1895_s1 + $0xf8] sm:$0xff]  ;;  %v1382_v36 = vld [vmem:[%s1895_s1 + $0xf0] sm:$0xff]  ;;  %v287_v57 = vld [vmem:[%s238_s10] sm:$0xff] }
  0x13   : > { %v675_v39 = vld [vmem:[%s1896_s2 + $0x38] sm:$0xff]  ;;  %v674_v40 = vld [vmem:[%s1896_s2 + $0x30] sm:$0xff]  ;;  %v423_v62 = vrot.slane %v287_v57, %v422_v53  ;;  %v427_v63 = vrot.slane %v287_v57, %v426_v54  ;;  %v340_v0 = vrot.slane %v287_v57, %v339_v55  ;;  %v344_v1 = vrot.slane %v287_v57, %v343_v56 }
  0x14   : > { %313 = vperm.xlu1 %1438, %v291_v7   ;;  %308 = vperm.xlu0 %1437, %v290_v8   ;;  %v522_v5 = vrot.slane %v287_v57, %v521_v58  ;;  %v526_v6 = vrot.slane %v287_v57, %v525_v59 }
  0x18   : > { %397 = vperm.xlu1 %1438, %v1363_v9   ;;  %392 = vperm.xlu0 %1437, %v1362_v10   ;;  %v1661_v9 = vrot.slane %v423_v62, %v422_v53  ;;  %v1663_v10 = vrot.slane %v427_v63, %v422_v53 }
  0x1c   : > { %585 = vperm.xlu1 %1438, %v1377_v11   ;;  %580 = vperm.xlu0 %1437, %v1376_v12   ;;  %v1665_v11 = vrot.slane %v340_v0, %v339_v55  ;;  %v1667_v12 = vrot.slane %v344_v1, %v339_v55 }
  0x20   : > { %496 = vperm.xlu1 %1438, %v1371_v13   ;;  %491 = vperm.xlu0 %1437, %v1370_v14   ;;  %v621_v13 = vrot.slane %v287_v57, %v620_v3  ;;  %v625_v14 = vrot.slane %v287_v57, %v624_v4 }
  0x24   : > { %323 = vperm.xlu1 %1438, %v293_v15   ;;  %318 = vperm.xlu0 %1437, %v292_v16   ;;  %v1669_v15 = vrot.slane %v522_v5, %v521_v58  ;;  %v1671_v16 = vrot.slane %v526_v6, %v521_v58 }
  0x28   : > { %407 = vperm.xlu1 %1438, %v1365_v17   ;;  %402 = vperm.xlu0 %1437, %v1364_v18  }
  0x2c   : > { %595 = vperm.xlu1 %1438, %v1379_v19   ;;  %590 = vperm.xlu0 %1437, %v1378_v20  }
  0x30   : > { %683 = vperm.xlu1 %1438, %v669_v21   ;;  %678 = vperm.xlu0 %1437, %v668_v22  }
  0x34   : > { %506 = vperm.xlu1 %1438, %v1373_v23   ;;  %501 = vperm.xlu0 %1437, %v1372_v24  }
  0x38   : > { %333 = vperm.xlu1 %1438, %v295_v25   ;;  %328 = vperm.xlu0 %1437, %v294_v26  }
  0x3c   : > { %417 = vperm.xlu1 %1438, %v1367_v27   ;;  %412 = vperm.xlu0 %1437, %v1366_v28   ;;  %v1685_v27 = vrot.slane %v621_v13, %v620_v3  ;;  %v1687_v28 = vrot.slane %v625_v14, %v620_v3 }
  0x40   : > { %605 = vperm.xlu1 %1438, %v1381_v29   ;;  %600 = vperm.xlu0 %1437, %v1380_v30  }
  0x44   : > { %693 = vperm.xlu1 %1438, %v671_v31   ;;  %688 = vperm.xlu0 %1437, %v670_v32  }
  0x48   : > { %516 = vperm.xlu1 %1438, %v1375_v33   ;;  %511 = vperm.xlu0 %1437, %v1374_v34  }
  0x4c   : > { %615 = vperm.xlu1 %1438, %v1383_v35   ;;  %610 = vperm.xlu0 %1437, %v1382_v36  }
  0x50   : > { %703 = vperm.xlu1 %1438, %v673_v37   ;;  %698 = vperm.xlu0 %1437, %v672_v38  }
  0x54   : > { %713 = vperm.xlu1 %1438, %v675_v39   ;;  %708 = vperm.xlu0 %1437, %v674_v40  }
  0x87   : > { %v383_v41 = vpop.permute.xlu1 %382  ;;  %v299_v42 = vpop.permute.xlu0 %298 }
  0x88   : > { %v438_v19 = vmul.f32 %v1661_v9, %v383_v41  ;;  %v439_v20 = vmul.f32 %v1663_v10, %v383_v41  ;;  %v355_v21 = vmul.f32 %v1665_v11, %v299_v42  ;;  %v356_v22 = vmul.f32 %v1667_v12, %v299_v42 }
  0x8a   : > { %v454_v35 = vadd.f32 %v438_v19, %v355_v21  ;;  %v455_v36 = vadd.f32 %v439_v20, %v356_v22 }
  0x8b   : > { %v388_v43 = vpop.permute.xlu1 %387  ;;  %v304_v44 = vpop.permute.xlu0 %303 }
  0x8c   : > { %v440_v23 = vmul.f32 %v1661_v9, %v388_v43  ;;  %v441_v24 = vmul.f32 %v1663_v10, %v388_v43  ;;  %v357_v25 = vmul.f32 %v1665_v11, %v304_v44  ;;  %v358_v26 = vmul.f32 %v1667_v12, %v304_v44 }
  0x8e   : > { %v456_v37 = vadd.f32 %v440_v23, %v357_v25  ;;  %v457_v38 = vadd.f32 %v441_v24, %v358_v26 }
  0x8f   : > { %v487_v45 = vpop.permute.xlu1 %486  ;;  %v482_v46 = vpop.permute.xlu0 %481 }
  0x90   : > { %v539_v31 = vmul.f32 %v1669_v15, %v487_v45  ;;  %v540_v32 = vmul.f32 %v1671_v16, %v487_v45  ;;  %v537_v33 = vmul.f32 %v1669_v15, %v482_v46  ;;  %v538_v34 = vmul.f32 %v1671_v16, %v482_v46 }
  0x92   : > { %v555_v47 = vadd.f32 %v539_v31, %v456_v37  ;;  %v556_v45 = vadd.f32 %v540_v32, %v457_v38  ;;  %v553_v50 = vadd.f32 %v537_v33, %v454_v35  ;;  %v554_v53 = vadd.f32 %v538_v34, %v455_v36 }
  0x93   : > { %v1646_v48 = vpop.permute.xlu1 %313  ;;  %v1648_v49 = vpop.permute.xlu0 %308 }
  0x94   : > { %v361_v31 = vmul.f32 %v1665_v11, %v1646_v48  ;;  %v362_v32 = vmul.f32 %v1667_v12, %v1646_v48  ;;  %v359_v34 = vmul.f32 %v1665_v11, %v1648_v49  ;;  %v360_v48 = vmul.f32 %v1667_v12, %v1648_v49 }
  0x97   : > { %v1653_v51 = vpop.permute.xlu1 %397  ;;  %v1655_v52 = vpop.permute.xlu0 %392 }
  0x98   : > { %v444_v20 = vmul.f32 %v1661_v9, %v1653_v51  ;;  %v445_v21 = vmul.f32 %v1663_v10, %v1653_v51  ;;  %v442_v22 = vmul.f32 %v1661_v9, %v1655_v52  ;;  %v443_v33 = vmul.f32 %v1663_v10, %v1655_v52 }
  0x9a   : > { %v460_v37 = vadd.f32 %v444_v20, %v361_v31  ;;  %v461_v52 = vadd.f32 %v445_v21, %v362_v32  ;;  %v458_v38 = vadd.f32 %v442_v22, %v359_v34 }
  0x9b   : > { %v586_v60 = vpop.permute.xlu1 %585  ;;  %v581_v61 = vpop.permute.xlu0 %580 }
  0x9c   : > { %v638_v39 = vmul.f32 %v1685_v27, %v586_v60  ;;  %v639_v40 = vmul.f32 %v1687_v28, %v586_v60  ;;  %v636_v41 = vmul.f32 %v1685_v27, %v581_v61  ;;  %v637_v42 = vmul.f32 %v1687_v28, %v581_v61 }
  0x9e   : > { %v654_v54 = vadd.f32 %v638_v39, %v555_v47  ;;  %v655_v46 = vadd.f32 %v639_v40, %v556_v45  ;;  %v652_v55 = vadd.f32 %v636_v41, %v553_v50  ;;  %v653_v56 = vadd.f32 %v637_v42, %v554_v53 }
  0x9f   : > { %v1657_v7 = vpop.permute.xlu1 %496  ;;  %v1659_v8 = vpop.permute.xlu0 %491  ;;  %v459_v41 = vadd.f32 %v443_v33, %v360_v48 }
  0xa0   : > { %v543_v51 = vmul.f32 %v1669_v15, %v1657_v7  ;;  %v544_v35 = vmul.f32 %v1671_v16, %v1657_v7  ;;  %v541_v36 = vmul.f32 %v1669_v15, %v1659_v8  ;;  %v542_v7 = vmul.f32 %v1671_v16, %v1659_v8 }
  0xa2   : > { %v559_v42 = vadd.f32 %v543_v51, %v460_v37  ;;  %v560_v47 = vadd.f32 %v544_v35, %v461_v52  ;;  %v557_v45 = vadd.f32 %v541_v36, %v458_v38 }
  0xa3   : > { %v1673_v17 = vpop.permute.xlu1 %323  ;;  %v1675_v18 = vpop.permute.xlu0 %318 }
  0xa4   : > { %v365_v50 = vmul.f32 %v1665_v11, %v1673_v17 }
  0xa7   : > { %v1689_v29 = vpop.permute.xlu1 %407  ;;  %v1691_v30 = vpop.permute.xlu0 %402 }
  0xa8   : > { %v448_v49 = vmul.f32 %v1661_v9, %v1689_v29  ;;  %v446_v8 = vmul.f32 %v1661_v9, %v1691_v30 }
  0xab   : > { %v596_v43 = vpop.permute.xlu1 %595  ;;  %v591_v44 = vpop.permute.xlu0 %590 }
  0xac   : > { %v642_v53 = vmul.f32 %v1685_v27, %v596_v43 }
  0xaf   : > { %v684_v57 = vpop.permute.xlu1 %683  ;;  %v679_v58 = vpop.permute.xlu0 %678 }
  0xb0   : > { %v718_v59 = vadd.f32 %v684_v57, %v654_v54  ;;  %v719_v62 = vadd.f32 %v684_v57, %v655_v46  ;;  %v716_v63 = vadd.f32 %v679_v58, %v652_v55  ;;  %v717_v60 = vadd.f32 %v679_v58, %v653_v56 }
  0xb1   : > { %v643_v54 = vmul.f32 %v1687_v28, %v596_v43  ;;  %v640_v46 = vmul.f32 %v1685_v27, %v591_v44  ;;  %v641_v55 = vmul.f32 %v1687_v28, %v591_v44  ;;  %v449_v56 = vmul.f32 %v1663_v10, %v1689_v29 }
  0xb2   : > { %v734_v0 = vmul.f32 0.2, %v718_v59  ;;  %v735_v1 = vmul.f32 0.2, %v719_v62  ;;  %v732_v3 = vmul.f32 0.2, %v716_v63  ;;  %v447_v57 = vmul.f32 %v1663_v10, %v1691_v30 }
  0xb3   : > { %v733_v61 = vmul.f32 0.2, %v717_v60  ;;  %v507_v4 = vpop.permute.xlu1 %506  ;;  %v502_v5 = vpop.permute.xlu0 %501  ;;  %v366_v43 = vmul.f32 %v1667_v12, %v1673_v17  ;;  %v363_v44 = vmul.f32 %v1665_v11, %v1675_v18  ;;  %v364_v29 = vmul.f32 %v1667_v12, %v1675_v18 }
  0xb4   : > { %v751_v13 = vmax.f32 %v719_v62, %v735_v1  ;;  %v748_v14 = vmax.f32 %v716_v63, %v732_v3  ;;  %v750_v19 = vmax.f32 %v718_v59, %v734_v0  ;;  %v547_v58 = vmul.f32 %v1669_v15, %v507_v4 }
  0xb5   : > { %v749_v6 = vmax.f32 %v717_v60, %v733_v61  ;;  %v558_v63 = vadd.f32 %v542_v7, %v459_v41  ;;  %v464_v60 = vadd.f32 %v448_v49, %v365_v50  ;;  %v548_v0 = vmul.f32 %v1671_v16, %v507_v4 }
  0xb6   : > { %v764_v26 = vpack.c.bf16 %v750_v19, %v748_v14  ;;  %v545_v1 = vmul.f32 %v1669_v15, %v502_v5  ;;  %v546_v30 = vmul.f32 %v1671_v16, %v502_v5  ;;  %v658_v3 = vadd.f32 %v642_v53, %v559_v42 }
  0xb7   : > { %v1707_v23 = vpop.permute.xlu1 %333  ;;  %v1709_v24 = vpop.permute.xlu0 %328  ;;  %v765_v25 = vpack.c.bf16 %v751_v13, %v749_v6  ;;  %v659_v61 = vadd.f32 %v643_v54, %v560_v47  ;;  %v656_v6 = vadd.f32 %v640_v46, %v557_v45  ;;  %v657_v13 = vadd.f32 %v641_v55, %v558_v63 }
  0xb8   : > { %v465_v14 = vadd.f32 %v449_v56, %v366_v43  ;;  %v462_v19 = vadd.f32 %v446_v8, %v363_v44  ;;  %v463_v17 = vadd.f32 %v447_v57, %v364_v29  ;;  %v563_v20 = vadd.f32 %v547_v58, %v464_v60 }
  0xb9   : > { %853 = vmatprep.subr.bf16.mxu0 %v765_v25  ;;  %1404 = vmatprep.subr.bf16.mxu1 %v765_v25  ;;  %v370_v49 = vmul.f32 %v1667_v12, %v1707_v23 }
  0xba   : > { %854 = vmatpush1.bf16.msra.mxu0 %v764_v26  ;;  %1408 = vmatpush1.bf16.msra.mxu1 %v764_v26  ;;  %v564_v32 = vadd.f32 %v548_v0, %v465_v14  ;;  %v561_v4 = vadd.f32 %v545_v1, %v462_v19  ;;  %v562_v33 = vadd.f32 %v546_v30, %v463_v17 }
  0xbb   : > { %v418_v39 = vpop.permute.xlu1 %417  ;;  %v413_v40 = vpop.permute.xlu0 %412 }
  0xbc   : > { %v452_v51 = vmul.f32 %v1661_v9, %v418_v39  ;;  %v453_v5 = vmul.f32 %v1663_v10, %v418_v39  ;;  %v450_v48 = vmul.f32 %v1661_v9, %v413_v40  ;;  %v451_v37 = vmul.f32 %v1663_v10, %v413_v40 }
  0xbd   : > { %v369_v39 = vmul.f32 %v1665_v11, %v1707_v23  ;;  %v367_v9 = vmul.f32 %v1665_v11, %v1709_v24  ;;  %v368_v40 = vmul.f32 %v1667_v12, %v1709_v24 }
  0xbe   : > { %v469_v56 = vadd.f32 %v453_v5, %v370_v49 }
  0xbf   : > { %v606_v59 = vpop.permute.xlu1 %605  ;;  %v601_v62 = vpop.permute.xlu0 %600  ;;  %v468_v55 = vadd.f32 %v452_v51, %v369_v39  ;;  %v466_v23 = vadd.f32 %v450_v48, %v367_v9  ;;  %v467_v63 = vadd.f32 %v451_v37, %v368_v40  ;;  %v1439_v40 = vld [vmem:[%s1897_s3] sm:$0xff]  }
  0xc0   : > { %v646_v52 = vmul.f32 %v1685_v27, %v606_v59  ;;  %v647_v7 = vmul.f32 %v1687_v28, %v606_v59  ;;  %v644_v53 = vmul.f32 %v1685_v27, %v601_v62  ;;  %v645_v54 = vmul.f32 %v1687_v28, %v601_v62 }
  0xc2   : > { %v662_v43 = vadd.f32 %v646_v52, %v563_v20  ;;  %v663_v11 = vadd.f32 %v647_v7, %v564_v32  ;;  %v660_v29 = vadd.f32 %v644_v53, %v561_v4  ;;  %v661_v60 = vadd.f32 %v645_v54, %v562_v33  ;;  %v1440_v53 = vld [vmem:[%s1897_s3 + $0x20] sm:$0xff]   ;;  %v1441_v54 = vld [vmem:[%s1897_s3 + $0x8] sm:$0xff]  }
  0xc3   : > { %v694_v21 = vpop.permute.xlu1 %693  ;;  %v689_v22 = vpop.permute.xlu0 %688 }
  0xc4   : > { %v722_v25 = vadd.f32 %v694_v21, %v658_v3  ;;  %v723_v26 = vadd.f32 %v694_v21, %v659_v61  ;;  %v720_v18 = vadd.f32 %v689_v22, %v656_v6  ;;  %v721_v31 = vadd.f32 %v689_v22, %v657_v13 }
  0xc6   : > { %v738_v34 = vmul.f32 0.2, %v722_v25  ;;  %v739_v35 = vmul.f32 0.2, %v723_v26  ;;  %v736_v36 = vmul.f32 0.2, %v720_v18 }
  0xc7   : > { %v737_v38 = vmul.f32 0.2, %v721_v31  ;;  %v517_v41 = vpop.permute.xlu1 %516  ;;  %v512_v42 = vpop.permute.xlu0 %511 }
  0xc8   : > { %v754_v47 = vmax.f32 %v722_v25, %v738_v34  ;;  %v755_v45 = vmax.f32 %v723_v26, %v739_v35  ;;  %v752_v50 = vmax.f32 %v720_v18, %v736_v36  ;;  %v551_v8 = vmul.f32 %v1669_v15, %v517_v41 }
  0xc9   : > { %v753_v10 = vmax.f32 %v721_v31, %v737_v38  ;;  %v552_v44 = vmul.f32 %v1671_v16, %v517_v41  ;;  %v549_v12 = vmul.f32 %v1669_v15, %v512_v42  ;;  %v550_v24 = vmul.f32 %v1671_v16, %v512_v42 }
  0xca   : > { %v766_v46 = vpack.c.bf16 %v754_v47, %v752_v50  ;;  %v567_v0 = vadd.f32 %v551_v8, %v468_v55  ;;  %v1443_v55 = vld [vmem:[%s1897_s3 + $0x10] sm:$0xff]   ;;  %v1445_v8 = vld [vmem:[%s1897_s3 + $0x18] sm:$0xff]  }
  0xcb   : > { %v616_v57 = vpop.permute.xlu1 %615  ;;  %v611_v58 = vpop.permute.xlu0 %610  ;;  %v767_v59 = vpack.c.bf16 %v755_v45, %v753_v10  ;;  %v568_v19 = vadd.f32 %v552_v44, %v469_v56  ;;  %v565_v17 = vadd.f32 %v549_v12, %v466_v23  ;;  %v566_v20 = vadd.f32 %v550_v24, %v467_v63  ;;  %v1444_v56 = vld [vmem:[%s1897_s3 + $0x30] sm:$0xff]  }
  0xcc   : > { %v650_v62 = vmul.f32 %v1685_v27, %v616_v57  ;;  %v651_v1 = vmul.f32 %v1687_v28, %v616_v57  ;;  %v648_v30 = vmul.f32 %v1685_v27, %v611_v58  ;;  %v649_v3 = vmul.f32 %v1687_v28, %v611_v58  ;;  %v1446_v57 = vld [vmem:[%s1897_s3 + $0x38] sm:$0xff]  }
  0xcd   : > { %855 = vmatprep.subr.bf16.mxu0 %v767_v59  ;;  %1405 = vmatprep.subr.bf16.mxu1 %v767_v59 }
  0xce   : > { %856 = vmatpush1.bf16.msra.mxu0 %v766_v46  ;;  %1409 = vmatpush1.bf16.msra.mxu1 %v766_v46  ;;  %v666_v26 = vadd.f32 %v650_v62, %v567_v0  ;;  %v667_v32 = vadd.f32 %v651_v1, %v568_v19  ;;  %v664_v27 = vadd.f32 %v648_v30, %v565_v17  ;;  %v1442_v46 = vld [vmem:[%s1897_s3 + $0x28] sm:$0xff]  }
  0xcf   : > { %v704_v61 = vpop.permute.xlu1 %703  ;;  %v699_v6 = vpop.permute.xlu0 %698  ;;  %v665_v33 = vadd.f32 %v649_v3, %v566_v20 }
  0xd0   : > { %v726_v15 = vadd.f32 %v704_v61, %v662_v43  ;;  %v727_v13 = vadd.f32 %v704_v61, %v663_v11  ;;  %v724_v16 = vadd.f32 %v699_v6, %v660_v29  ;;  %v725_v14 = vadd.f32 %v699_v6, %v661_v60 }
  0xd2   : > { %v742_v21 = vmul.f32 0.2, %v726_v15  ;;  %v743_v22 = vmul.f32 0.2, %v727_v13  ;;  %v740_v25 = vmul.f32 0.2, %v724_v16 }
  0xd3   : > { %v741_v18 = vmul.f32 0.2, %v725_v14  ;;  %v714_v31 = vpop.permute.xlu1 %713  ;;  %v709_v4 = vpop.permute.xlu0 %708 }
  0xd4   : > { %v758_v28 = vmax.f32 %v726_v15, %v742_v21  ;;  %v759_v51 = vmax.f32 %v727_v13, %v743_v22  ;;  %v756_v5 = vmax.f32 %v724_v16, %v740_v25  ;;  %v730_v34 = vadd.f32 %v714_v31, %v666_v26 }
  0xd5   : > { %v757_v35 = vmax.f32 %v725_v14, %v741_v18  ;;  %v731_v36 = vadd.f32 %v714_v31, %v667_v32  ;;  %v728_v48 = vadd.f32 %v709_v4, %v664_v27  ;;  %v729_v37 = vadd.f32 %v709_v4, %v665_v33 }
  0xd6   : > { %v746_v52 = vmul.f32 0.2, %v730_v34  ;;  %v768_v38 = vpack.c.bf16 %v758_v28, %v756_v5 }
  0xd7   : > { %v747_v41 = vmul.f32 0.2, %v731_v36  ;;  %v744_v42 = vmul.f32 0.2, %v728_v48  ;;  %v745_v7 = vmul.f32 0.2, %v729_v37  ;;  %v769_v47 = vpack.c.bf16 %v759_v51, %v757_v35 }
  0xd8   : > { %v762_v45 = vmax.f32 %v730_v34, %v746_v52 }
  0xd9   : > { %v763_v50 = vmax.f32 %v731_v36, %v747_v41  ;;  %v760_v39 = vmax.f32 %v728_v48, %v744_v42  ;;  %v761_v49 = vmax.f32 %v729_v37, %v745_v7  ;;  %857 = vmatprep.subr.bf16.mxu0 %v769_v47  ;;  %1406 = vmatprep.subr.bf16.mxu1 %v769_v47 }
  0xda   : > { %858 = vmatpush1.bf16.msra.mxu0 %v768_v38  ;;  %1410 = vmatpush1.bf16.msra.mxu1 %v768_v38 }
  0xdb   : > { %v771_v9 = vpack.c.bf16 %v763_v50, %v761_v49  ;;  %v770_v10 = vpack.c.bf16 %v762_v45, %v760_v39 }
  0xdd   : > { %859 = vmatprep.subr.bf16.mxu0 %v771_v9  ;;  %1407 = vmatprep.subr.bf16.mxu1 %v771_v9 }
  0xde   : > { %860 = vmatpush1.bf16.msra.mxu0 %v770_v10  ;;  %1411 = vmatpush1.bf16.msra.mxu1 %v770_v10 }
  0xe1   : > { %1392 = vmatmul.mubr.msk.bf16.vlgmr.msra.gmra.mrb[0].mxu0 %vm828_vm0, %v1439_v40  ;;  %1396 = vmatmul.mubr.msk.bf16.vlgmr.msra.gmra.mrb[0].mxu1 %vm828_vm0, %v1440_v53 }
  0xe2   : > { %895 = vmatprep.mubr.bf16.mxu0 %v1471_v2  ;;  %935 = vmatprep.mubr.bf16.mxu1 %v1471_v2 }
  0xe9   : > { %1393 = vmatmul.mubr.msk.bf16.gmra.mrb[4].mxu0 %vm828_vm0, %v1441_v54  ;;  %1397 = vmatmul.mubr.msk.bf16.gmra.mrb[4].mxu1 %vm828_vm0, %v1442_v46 }
  0xea   : > { %905 = vmatprep.mubr.bf16.mxu0 %v1471_v2  ;;  %945 = vmatprep.mubr.bf16.mxu1 %v1471_v2 }
  0xf1   : > { %1394 = vmatmul.mubr.msk.bf16.gmra.mrb[8].mxu0 %vm828_vm0, %v1443_v55  ;;  %1398 = vmatmul.mubr.msk.bf16.gmra.mrb[8].mxu1 %vm828_vm0, %v1444_v56 }
  0xf2   : > { %915 = vmatprep.mubr.bf16.mxu0 %v1471_v2  ;;  %955 = vmatprep.mubr.bf16.mxu1 %v1471_v2 }
  0xf9   : > { %1395 = vmatmul.mubr.msk.bf16.gmra.mrb[12].mxu0 %vm828_vm0, %v1445_v8  ;;  %1399 = vmatmul.mubr.msk.bf16.gmra.mrb[12].mxu1 %vm828_vm0, %v1446_v57 }
 0x1b4   : > { %v887_v58 = vpop.f32.mrb[0].mxu0  ;;  %v927_v59 = vpop.f32.mrb[0].mxu1 }
 0x1b5   : > { %v966_v23 = vmul.f32 %v887_v58, %v887_v58  ;;  %v982_v63 = vmul.f32 %v927_v59, %v927_v59  ;;  %v889_v43 = vpop.f32.mrb[1].mxu0  ;;  %v929_v11 = vpop.f32.mrb[1].mxu1 }
 0x1b6   : > { %v967_v44 = vmul.f32 %v889_v43, %v889_v43  ;;  %v983_v2 = vmul.f32 %v929_v11, %v929_v11  ;;  %v891_v12 = vpop.f32.mrb[2].mxu0  ;;  %v931_v24 = vpop.f32.mrb[2].mxu1  ;;  %v1006_v62 = vadd.f32 %v929_v11, %v927_v59  ;;  %v998_v29 = vadd.f32 %v889_v43, %v887_v58 }
 0x1b7   : > { %v968_v60 = vmul.f32 %v891_v12, %v891_v12  ;;  %v984_v0 = vmul.f32 %v931_v24, %v931_v24  ;;  %v893_v1 = vpop.f32.mrb[3].mxu0  ;;  %v933_v30 = vpop.f32.mrb[3].mxu1 }
 0x1b8   : > { %v969_v3 = vmul.f32 %v893_v1, %v893_v1  ;;  %v985_v61 = vmul.f32 %v933_v30, %v933_v30  ;;  %1161 = vadd.xlane.f32.xlu1 %v1006_v62  ;;  %1145 = vadd.xlane.f32.xlu0 %v998_v29  ;;  %v1007_v6 = vadd.f32 %v933_v30, %v931_v24 }
 0x1b9   : > { %v999_v15 = vadd.f32 %v893_v1, %v891_v12  ;;  %v1014_v13 = vadd.f32 %v967_v44, %v966_v23  ;;  %v1022_v16 = vadd.f32 %v983_v2, %v982_v63 }
 0x1ba   : > { %v1015_v14 = vadd.f32 %v969_v3, %v968_v60  ;;  %v1023_v19 = vadd.f32 %v985_v61, %v984_v0 }
 0x1bc   : > { %1163 = vadd.xlane.f32.xlu0 %v1007_v6  ;;  %1147 = vadd.xlane.f32.xlu1 %v999_v15  ;;  %v897_v17 = vpop.f32.mrb[4].mxu0  ;;  %v937_v20 = vpop.f32.mrb[4].mxu1 }
 0x1bd   : > { %v970_v21 = vmul.f32 %v897_v17, %v897_v17  ;;  %v899_v22 = vpop.f32.mrb[5].mxu0  ;;  %v986_v25 = vmul.f32 %v937_v20, %v937_v20  ;;  %v939_v26 = vpop.f32.mrb[5].mxu1 }
 0x1be   : > { %v971_v18 = vmul.f32 %v899_v22, %v899_v22  ;;  %v901_v31 = vpop.f32.mrb[6].mxu0  ;;  %v987_v32 = vmul.f32 %v939_v26, %v939_v26  ;;  %v1008_v4 = vadd.f32 %v939_v26, %v937_v20  ;;  %v1000_v27 = vadd.f32 %v899_v22, %v897_v17  ;;  %v941_v33 = vpop.f32.mrb[6].mxu1 }
 0x1bf   : > { %v972_v28 = vmul.f32 %v901_v31, %v901_v31  ;;  %v903_v51 = vpop.f32.mrb[7].mxu0  ;;  %v988_v5 = vmul.f32 %v941_v33, %v941_v33  ;;  %v943_v34 = vpop.f32.mrb[7].mxu1 }
 0x1c0   : > { %1210 = vadd.xlane.f32.xlu1 %v1014_v13  ;;  %1212 = vadd.xlane.f32.xlu0 %v1015_v14  ;;  %v973_v35 = vmul.f32 %v903_v51, %v903_v51  ;;  %v989_v36 = vmul.f32 %v943_v34, %v943_v34  ;;  %v1016_v48 = vadd.f32 %v971_v18, %v970_v21 }
 0x1c1   : > { %v1001_v37 = vadd.f32 %v903_v51, %v901_v31  ;;  %v1024_v52 = vadd.f32 %v987_v32, %v986_v25  ;;  %v1009_v38 = vadd.f32 %v943_v34, %v941_v33 }
 0x1c2   : > { %v1017_v41 = vadd.f32 %v973_v35, %v972_v28  ;;  %v1025_v42 = vadd.f32 %v989_v36, %v988_v5 }
 0x1c4   : > { %1226 = vadd.xlane.f32.xlu1 %v1022_v16  ;;  %1228 = vadd.xlane.f32.xlu0 %v1023_v19  ;;  %v907_v7 = vpop.f32.mrb[8].mxu0  ;;  %v947_v47 = vpop.f32.mrb[8].mxu1 }
 0x1c5   : > { %v974_v45 = vmul.f32 %v907_v7, %v907_v7  ;;  %v909_v50 = vpop.f32.mrb[9].mxu0  ;;  %v990_v39 = vmul.f32 %v947_v47, %v947_v47  ;;  %v949_v49 = vpop.f32.mrb[9].mxu1 }
 0x1c6   : > { %v975_v9 = vmul.f32 %v909_v50, %v909_v50  ;;  %v1002_v10 = vadd.f32 %v909_v50, %v907_v7  ;;  %v911_v40 = vpop.f32.mrb[10].mxu0  ;;  %v991_v53 = vmul.f32 %v949_v49, %v949_v49  ;;  %v1010_v54 = vadd.f32 %v949_v49, %v947_v47  ;;  %v951_v46 = vpop.f32.mrb[10].mxu1 }
 0x1c7   : > { %v976_v55 = vmul.f32 %v911_v40, %v911_v40  ;;  %v913_v56 = vpop.f32.mrb[11].mxu0  ;;  %v992_v8 = vmul.f32 %v951_v46, %v951_v46  ;;  %v953_v57 = vpop.f32.mrb[11].mxu1 }
 0x1c8   : > { %1165 = vadd.xlane.f32.xlu1 %v1008_v4  ;;  %1149 = vadd.xlane.f32.xlu0 %v1000_v27  ;;  %v977_v58 = vmul.f32 %v913_v56, %v913_v56  ;;  %v993_v59 = vmul.f32 %v953_v57, %v953_v57  ;;  %v1018_v23 = vadd.f32 %v975_v9, %v974_v45 }
 0x1c9   : > { %v1003_v63 = vadd.f32 %v913_v56, %v911_v40  ;;  %v1026_v43 = vadd.f32 %v991_v53, %v990_v39  ;;  %v1011_v11 = vadd.f32 %v953_v57, %v951_v46 }
 0x1ca   : > { %v1019_v44 = vadd.f32 %v977_v58, %v976_v55  ;;  %v1027_v2 = vadd.f32 %v993_v59, %v992_v8 }
 0x1cc   : > { %1214 = vadd.xlane.f32.xlu1 %v1016_v48  ;;  %1151 = vadd.xlane.f32.xlu0 %v1001_v37  ;;  %v917_v12 = vpop.f32.mrb[12].mxu0  ;;  %v957_v24 = vpop.f32.mrb[12].mxu1 }
 0x1cd   : > { %v978_v62 = vmul.f32 %v917_v12, %v917_v12  ;;  %v919_v29 = vpop.f32.mrb[13].mxu0  ;;  %v994_v60 = vmul.f32 %v957_v24, %v957_v24  ;;  %v959_v0 = vpop.f32.mrb[13].mxu1 }
 0x1ce   : > { %v979_v1 = vmul.f32 %v919_v29, %v919_v29  ;;  %v1004_v30 = vadd.f32 %v919_v29, %v917_v12  ;;  %v921_v3 = vpop.f32.mrb[14].mxu0  ;;  %v995_v61 = vmul.f32 %v959_v0, %v959_v0  ;;  %v1012_v6 = vadd.f32 %v959_v0, %v957_v24  ;;  %v961_v15 = vpop.f32.mrb[14].mxu1 }
 0x1cf   : > { %v980_v13 = vmul.f32 %v921_v3, %v921_v3  ;;  %v923_v16 = vpop.f32.mrb[15].mxu0  ;;  %v996_v14 = vmul.f32 %v961_v15, %v961_v15  ;;  %v963_v19 = vpop.f32.mrb[15].mxu1 }
 0x1d0   : > { %1230 = vadd.xlane.f32.xlu1 %v1024_v52  ;;  %1167 = vadd.xlane.f32.xlu0 %v1009_v38  ;;  %v981_v17 = vmul.f32 %v923_v16, %v923_v16  ;;  %v1005_v20 = vadd.f32 %v923_v16, %v921_v3  ;;  %v997_v21 = vmul.f32 %v963_v19, %v963_v19 }
 0x1d1   : > { %v1013_v22 = vadd.f32 %v963_v19, %v961_v15  ;;  %v1020_v25 = vadd.f32 %v979_v1, %v978_v62  ;;  %v1028_v26 = vadd.f32 %v995_v61, %v994_v60 }
 0x1d2   : > { %v1021_v18 = vadd.f32 %v981_v17, %v980_v13  ;;  %v1029_v31 = vadd.f32 %v997_v21, %v996_v14 }
 0x1d4   : > { %1216 = vadd.xlane.f32.xlu0 %v1017_v41  ;;  %1153 = vadd.xlane.f32.xlu1 %v1002_v10 }
 0x1d8   : > { %1232 = vadd.xlane.f32.xlu0 %v1025_v42  ;;  %1169 = vadd.xlane.f32.xlu1 %v1010_v54 }
 0x1dc   : > { %1218 = vadd.xlane.f32.xlu1 %v1018_v23  ;;  %1155 = vadd.xlane.f32.xlu0 %v1003_v63 }
 0x1e0   : > { %1234 = vadd.xlane.f32.xlu1 %v1026_v43  ;;  %1171 = vadd.xlane.f32.xlu0 %v1011_v11 }
 0x1e4   : > { %1220 = vadd.xlane.f32.xlu0 %v1019_v44  ;;  %1157 = vadd.xlane.f32.xlu1 %v1004_v30 }
 0x1e8   : > { %1236 = vadd.xlane.f32.xlu0 %v1027_v2  ;;  %1173 = vadd.xlane.f32.xlu1 %v1012_v6 }
 0x1ec   : > { %1222 = vadd.xlane.f32.xlu1 %v1020_v25  ;;  %1159 = vadd.xlane.f32.xlu0 %v1005_v20 }
 0x1f0   : > { %1238 = vadd.xlane.f32.xlu1 %v1028_v26  ;;  %1175 = vadd.xlane.f32.xlu0 %v1013_v22 }
 0x1f4   : > { %1224 = vadd.xlane.f32.xlu0 %v1021_v18 }
 0x1f8   : > { %1240 = vadd.xlane.f32.xlu0 %v1029_v31 }
 0x245   : > { %v1162_v32 = vpop.xlane.xlu1 %1161  ;;  %v1146_v4 = vpop.xlane.xlu0 %1145 }
 0x246   : > { %1186 = vst.msk [vmem:[%s1819_s8 + $0x40] sm:$0xff] %vm1177_vm1, %v1162_v32  ;;  %1178 = vst.msk [vmem:[%s1819_s8] sm:$0xff] %vm1177_vm1, %v1146_v4 }
 0x249   : > { %v1164_v27 = vpop.xlane.xlu0 %1163  ;;  %v1148_v33 = vpop.xlane.xlu1 %1147 }
 0x24a   : > { %1187 = vst.msk [vmem:[%s1819_s8 + $0x48] sm:$0xff] %vm1177_vm1, %v1164_v27  ;;  %1179 = vst.msk [vmem:[%s1819_s8 + $0x8] sm:$0xff] %vm1177_vm1, %v1148_v33 }
 0x24d   : > { %v1211_v28 = vpop.xlane.xlu1 %1210  ;;  %v1213_v51 = vpop.xlane.xlu0 %1212 }
 0x24e   : > { %1243 = vst.msk [vmem:[%s1819_s8] sm:$0xff] %vm1242_vm2, %v1211_v28  ;;  %1244 = vst.msk [vmem:[%s1819_s8 + $0x8] sm:$0xff] %vm1242_vm2, %v1213_v51 }
 0x251   : > { %v1227_v5 = vpop.xlane.xlu1 %1226  ;;  %v1229_v34 = vpop.xlane.xlu0 %1228 }
 0x252   : > { %1251 = vst.msk [vmem:[%s1819_s8 + $0x40] sm:$0xff] %vm1242_vm2, %v1227_v5  ;;  %1252 = vst.msk [vmem:[%s1819_s8 + $0x48] sm:$0xff] %vm1242_vm2, %v1229_v34 }
 0x255   : > { %v1166_v35 = vpop.xlane.xlu1 %1165  ;;  %v1150_v36 = vpop.xlane.xlu0 %1149 }
 0x256   : > { %1188 = vst.msk [vmem:[%s1819_s8 + $0x50] sm:$0xff] %vm1177_vm1, %v1166_v35  ;;  %1180 = vst.msk [vmem:[%s1819_s8 + $0x10] sm:$0xff] %vm1177_vm1, %v1150_v36 }
 0x259   : > { %v1215_v48 = vpop.xlane.xlu1 %1214  ;;  %v1152_v37 = vpop.xlane.xlu0 %1151 }
 0x25a   : > { %1245 = vst.msk [vmem:[%s1819_s8 + $0x10] sm:$0xff] %vm1242_vm2, %v1215_v48 }
 0x25b   : > { %1181 = vst.msk [vmem:[%s1819_s8 + $0x18] sm:$0xff] %vm1177_vm1, %v1152_v37 }
 0x25d   : > { %v1231_v52 = vpop.xlane.xlu1 %1230  ;;  %v1168_v38 = vpop.xlane.xlu0 %1167 }
 0x25e   : > { %1253 = vst.msk [vmem:[%s1819_s8 + $0x50] sm:$0xff] %vm1242_vm2, %v1231_v52 }
 0x25f   : > { %1189 = vst.msk [vmem:[%s1819_s8 + $0x58] sm:$0xff] %vm1177_vm1, %v1168_v38 }
 0x261   : > { %v1217_v41 = vpop.xlane.xlu0 %1216  ;;  %v1154_v42 = vpop.xlane.xlu1 %1153 }
 0x262   : > { %1246 = vst.msk [vmem:[%s1819_s8 + $0x18] sm:$0xff] %vm1242_vm2, %v1217_v41 }
 0x263   : > { %1182 = vst.msk [vmem:[%s1819_s8 + $0x20] sm:$0xff] %vm1177_vm1, %v1154_v42 }
 0x265   : > { %v1233_v7 = vpop.xlane.xlu0 %1232  ;;  %v1170_v47 = vpop.xlane.xlu1 %1169 }
 0x266   : > { %1254 = vst.msk [vmem:[%s1819_s8 + $0x58] sm:$0xff] %vm1242_vm2, %v1233_v7 }
 0x267   : > { %1190 = vst.msk [vmem:[%s1819_s8 + $0x60] sm:$0xff] %vm1177_vm1, %v1170_v47 }
 0x269   : > { %v1219_v45 = vpop.xlane.xlu1 %1218  ;;  %v1156_v50 = vpop.xlane.xlu0 %1155 }
 0x26a   : > { %1247 = vst.msk [vmem:[%s1819_s8 + $0x20] sm:$0xff] %vm1242_vm2, %v1219_v45 }
 0x26b   : > { %1183 = vst.msk [vmem:[%s1819_s8 + $0x28] sm:$0xff] %vm1177_vm1, %v1156_v50 }
 0x26d   : > { %v1235_v39 = vpop.xlane.xlu1 %1234  ;;  %v1172_v49 = vpop.xlane.xlu0 %1171 }
 0x26e   : > { %1255 = vst.msk [vmem:[%s1819_s8 + $0x60] sm:$0xff] %vm1242_vm2, %v1235_v39 }
 0x26f   : > { %1191 = vst.msk [vmem:[%s1819_s8 + $0x68] sm:$0xff] %vm1177_vm1, %v1172_v49 }
 0x271   : > { %v1221_v9 = vpop.xlane.xlu0 %1220  ;;  %v1158_v10 = vpop.xlane.xlu1 %1157 }
 0x272   : > { %1248 = vst.msk [vmem:[%s1819_s8 + $0x28] sm:$0xff] %vm1242_vm2, %v1221_v9 }
 0x273   : > { %1184 = vst.msk [vmem:[%s1819_s8 + $0x30] sm:$0xff] %vm1177_vm1, %v1158_v10 }
 0x275   : > { %v1237_v40 = vpop.xlane.xlu0 %1236  ;;  %v1174_v53 = vpop.xlane.xlu1 %1173 }
 0x276   : > { %1256 = vst.msk [vmem:[%s1819_s8 + $0x68] sm:$0xff] %vm1242_vm2, %v1237_v40 }
 0x277   : > { %1192 = vst.msk [vmem:[%s1819_s8 + $0x70] sm:$0xff] %vm1177_vm1, %v1174_v53 }
 0x279   : > { %v1223_v54 = vpop.xlane.xlu1 %1222  ;;  %v1160_v46 = vpop.xlane.xlu0 %1159 }
 0x27a   : > { %1249 = vst.msk [vmem:[%s1819_s8 + $0x30] sm:$0xff] %vm1242_vm2, %v1223_v54 }
 0x27b   : > { %1185 = vst.msk [vmem:[%s1819_s8 + $0x38] sm:$0xff] %vm1177_vm1, %v1160_v46 }
 0x27d   : > { %v1239_v55 = vpop.xlane.xlu1 %1238  ;;  %v1176_v56 = vpop.xlane.xlu0 %1175 }
 0x27e   : > { %1257 = vst.msk [vmem:[%s1819_s8 + $0x70] sm:$0xff] %vm1242_vm2, %v1239_v55 }
 0x27f   : > { %1193 = vst.msk [vmem:[%s1819_s8 + $0x78] sm:$0xff] %vm1177_vm1, %v1176_v56 }
 0x281   : > { %v1225_v8 = vpop.xlane.xlu0 %1224 }
 0x282   : > { %1250 = vst.msk [vmem:[%s1819_s8 + $0x38] sm:$0xff] %vm1242_vm2, %v1225_v8 }
 0x285   : > { %v1241_v57 = vpop.xlane.xlu0 %1240 }
 0x286   : > { %1258 = vst.msk [vmem:[%s1819_s8 + $0x78] sm:$0xff] %vm1242_vm2, %v1241_v57 }
 0x287 PF: > { %s14_s17 = sadd.s32 1, %s1469_s17   ;;  %s1899_s15 = smov %s1465_s16 }
 0x288   : > { %p11_p5 = scmp.ge.s32.totalorder %s14_s17, 4   ;;  %s1900_s16 = smov %s1902_s18 }
 0x28a   :  { %13 = sbr.rel (!%p11_p5) target bundleno = 2 (0x2), region = 77 }

// kernel: pixel_discriminator_forward.3
= control target key start
LH: loop header
LB: loop body
LE: loop exit
PB: predicated region body
PF: predicated region fallthrough
CT: control target
= control target key end

     0   :  { %s1751_s24 = smov 0   ;;  %s1753_s25 = smov 0   ;;  %s2439_s0 = inlined_call_operand.vmem [shape: f32[2,4,256], index: 0, kind: input, shape index: {}]   ;;  %s2440_s1 = inlined_call_operand.vmem [shape: f32[4,64,1], index: 1, kind: input, shape index: {}]   ;;  %s2441_s2 = inlined_call_operand.vmem [shape: f32[64,1], index: 2, kind: input, shape index: {}]   ;;  %s2442_s3 = inlined_call_operand.vmem [shape: bf16[128,64], index: 3, kind: input, shape index: {}]   ;;  %s2443_s4 = inlined_call_operand.vmem [shape: f32[128,1], index: 4, kind: input, shape index: {}]   ;;  %s2444_s5 = inlined_call_operand.vmem [shape: f32[128,1], index: 5, kind: input, shape index: {}]   ;;  %s2445_s6 = inlined_call_operand.vmem [shape: f32[128,1], index: 6, kind: input, shape index: {}]   ;;  %s2446_s7 = inlined_call_operand.vmem [shape: f32[2,1,256], index: 7, kind: output, shape index: {}]  }
   0x1   :  { %s1755_s26 = smov 0  }
   0x2 LB: > { %s29_s27 = sadd.s32 1, %s1703_s25  ;;  %p1594_p0 = scmp.ge.s32.totalorder %s1707_s26, 1  ;;  %s1707_s26 = sphi %s1755_s26, %s17_s26   ;;  %s1703_s25 = sphi %s1753_s25, %s2448_s25   ;;  %s1699_s24 = sphi %s1751_s24, %s2447_s24  }
   0x3   : > { %p31_p1 = scmp.ge.s32.totalorder %s29_s27, 2  ;;  %p258_p2 = scmp.lt.s32.totalorder %s1707_s26, 3 }
   0x5   : > { %s2450_s27 = smov (%p31_p1, %s29_s27), 0  ;;  %p259_p3 = pnand %p1594_p0, %p258_p2 }
   0x6   : > { %v1598_v0 = vld [vmem:[%s2440_s1 + $0x40] sm:$0xff] (!%p259_p3)  ;;  %v1709_v2 = vmov (!%p259_p3), 0   ;;  %v1599_v3 = vld [vmem:[%s2440_s1 + $0x48] sm:$0xff] (!%p259_p3)  ;;  %v321_v7 = vld [vmem:[%s2440_s1 + $0x18] sm:$0xff] (!%p259_p3)  ;;  %p298_p4 = scmp.lt.s32.totalorder (!%p259_p3), %s1699_s24, 1  ;;  %vm858_vm0 = vcmask (!%p259_p3), 523264  }
   0x7   : > { %262 = sbr.rel (%p259_p3) target bundleno = 515 (0x203), region = 48  ;;  %v318_v1 = vld [vmem:[%s2440_s1] sm:$0xff] (!%p259_p3)  ;;  %1676 = vset.pattern.permute.xlu1 (!%p259_p3), %v1709_v2  ;;  %1675 = vset.pattern.permute.xlu0 (!%p259_p3), %v1709_v2  ;;  %v319_v4 = vld [vmem:[%s2440_s1 + $0x8] sm:$0xff] (!%p259_p3)  ;;  %v320_v8 = vld [vmem:[%s2440_s1 + $0x10] sm:$0xff] (!%p259_p3) }
   0x8   : > { %412 = vperm.xlu1 (!%p259_p3), %1676, %v1598_v0   ;;  %328 = vperm.xlu0 (!%p259_p3), %1675, %v318_v1   ;;  %v1607_v5 = vld [vmem:[%s2440_s1 + $0x88] sm:$0xff] (!%p259_p3)  ;;  %v1606_v6 = vld [vmem:[%s2440_s1 + $0x80] sm:$0xff] (!%p259_p3)  ;;  %v1601_v9 = vld [vmem:[%s2440_s1 + $0x58] sm:$0xff] (!%p259_p3) }
   0x9   : > { %915 = vmatprep.mubr.bf16.mxu0 (!%p259_p3), %v1709_v2  ;;  %955 = vmatprep.mubr.bf16.mxu1 (!%p259_p3), %v1709_v2  ;;  %v1600_v10 = vld [vmem:[%s2440_s1 + $0x50] sm:$0xff] (!%p259_p3)  ;;  %v1615_v11 = vld [vmem:[%s2440_s1 + $0xc8] sm:$0xff] (!%p259_p3)  ;;  %v1614_v12 = vld [vmem:[%s2440_s1 + $0xc0] sm:$0xff] (!%p259_p3) }
   0xa   : > { %v1609_v13 = vld [vmem:[%s2440_s1 + $0x98] sm:$0xff] (!%p259_p3)  ;;  %v1608_v14 = vld [vmem:[%s2440_s1 + $0x90] sm:$0xff] (!%p259_p3)  ;;  %v323_v15 = vld [vmem:[%s2440_s1 + $0x28] sm:$0xff] (!%p259_p3) }
   0xb   : > { %v322_v16 = vld [vmem:[%s2440_s1 + $0x20] sm:$0xff] (!%p259_p3)  ;;  %v1603_v17 = vld [vmem:[%s2440_s1 + $0x68] sm:$0xff] (!%p259_p3)  ;;  %v1617_v19 = vld [vmem:[%s2440_s1 + $0xd8] sm:$0xff] (!%p259_p3) }
   0xc   : > { %417 = vperm.xlu1 (!%p259_p3), %1676, %v1599_v3   ;;  %333 = vperm.xlu0 (!%p259_p3), %1675, %v319_v4   ;;  %v1602_v18 = vld [vmem:[%s2440_s1 + $0x60] sm:$0xff] (!%p259_p3)  ;;  %v1616_v20 = vld [vmem:[%s2440_s1 + $0xd0] sm:$0xff] (!%p259_p3)  ;;  %v699_v21 = vld [vmem:[%s2441_s2 + $0x8] sm:$0xff] (!%p259_p3) }
   0xd   : > { %v698_v22 = vld [vmem:[%s2441_s2] sm:$0xff] (!%p259_p3)  ;;  %v1611_v23 = vld [vmem:[%s2440_s1 + $0xa8] sm:$0xff] (!%p259_p3)  ;;  %v325_v25 = vld [vmem:[%s2440_s1 + $0x38] sm:$0xff] (!%p259_p3) }
   0xe   : > { %v1610_v24 = vld [vmem:[%s2440_s1 + $0xa0] sm:$0xff]  ;;  %v324_v26 = vld [vmem:[%s2440_s1 + $0x30] sm:$0xff]  ;;  %v1605_v27 = vld [vmem:[%s2440_s1 + $0x78] sm:$0xff]  ;;  %s2452_s24 = smov (!%p298_p4, %s1699_s24), 1 }
   0xf   : > { %v1604_v28 = vld [vmem:[%s2440_s1 + $0x70] sm:$0xff]  ;;  %v1619_v29 = vld [vmem:[%s2440_s1 + $0xe8] sm:$0xff]  ;;  %v1618_v30 = vld [vmem:[%s2440_s1 + $0xe0] sm:$0xff]  ;;  %s1640_s16 = sshll.u32 %s2452_s24, 3  ;;  %s1597_s11 = sshll.u32 %s2452_s24, 1 }
  0x10   : > { %516 = vperm.xlu1 %1676, %v1607_v5   ;;  %511 = vperm.xlu0 %1675, %v1606_v6   ;;  %v701_v31 = vld [vmem:[%s2441_s2 + $0x18] sm:$0xff]  ;;  %v700_v32 = vld [vmem:[%s2441_s2 + $0x10] sm:$0xff]  ;;  %v703_v37 = vld [vmem:[%s2441_s2 + $0x28] sm:$0xff]  ;;  %s305_s21 = scalar_lea.vmem %s2439_s0, %s1640_s16  ;;  %s314_s14 = scalar_lea.vmem %s2446_s7, %s1597_s11 }
  0x11   : > { %v1613_v33 = vld [vmem:[%s2440_s1 + $0xb8] sm:$0xff]  ;;  %v1612_v34 = vld [vmem:[%s2440_s1 + $0xb0] sm:$0xff]  ;;  %v702_v38 = vld [vmem:[%s2441_s2 + $0x20] sm:$0xff] }
  0x12   : > { %v1621_v35 = vld [vmem:[%s2440_s1 + $0xf8] sm:$0xff]  ;;  %v1620_v36 = vld [vmem:[%s2440_s1 + $0xf0] sm:$0xff]  ;;  %v997_v41 = vld [vmem:[%s2443_s4 + $0x8] sm:$0xff] }
  0x13   : > { %v705_v39 = vld [vmem:[%s2441_s2 + $0x38] sm:$0xff]  ;;  %v704_v40 = vld [vmem:[%s2441_s2 + $0x30] sm:$0xff]  ;;  %v996_v42 = vld [vmem:[%s2443_s4] sm:$0xff] }
  0x14   : > { %343 = vperm.xlu1 %1676, %v321_v7   ;;  %338 = vperm.xlu0 %1675, %v320_v8   ;;  %v999_v43 = vld [vmem:[%s2443_s4 + $0x18] sm:$0xff]  ;;  %v998_v44 = vld [vmem:[%s2443_s4 + $0x10] sm:$0xff]  ;;  %v1001_v45 = vld [vmem:[%s2443_s4 + $0x28] sm:$0xff] }
  0x15   : > { %v1000_v46 = vld [vmem:[%s2443_s4 + $0x20] sm:$0xff]  ;;  %v1003_v47 = vld [vmem:[%s2443_s4 + $0x38] sm:$0xff]  ;;  %v1002_v48 = vld [vmem:[%s2443_s4 + $0x30] sm:$0xff] }
  0x16   : > { %v1005_v49 = vld [vmem:[%s2443_s4 + $0x48] sm:$0xff]  ;;  %v1004_v50 = vld [vmem:[%s2443_s4 + $0x40] sm:$0xff]  ;;  %v1007_v51 = vld [vmem:[%s2443_s4 + $0x58] sm:$0xff] }
  0x17   : > { %v1006_v52 = vld [vmem:[%s2443_s4 + $0x50] sm:$0xff]  ;;  %v1009_v53 = vld [vmem:[%s2443_s4 + $0x68] sm:$0xff]  ;;  %v1008_v54 = vld [vmem:[%s2443_s4 + $0x60] sm:$0xff] }
  0x18   : > { %427 = vperm.xlu1 %1676, %v1601_v9   ;;  %422 = vperm.xlu0 %1675, %v1600_v10   ;;  %v1011_v55 = vld [vmem:[%s2443_s4 + $0x78] sm:$0xff]  ;;  %v1010_v56 = vld [vmem:[%s2443_s4 + $0x70] sm:$0xff]  ;;  %v1125_v57 = vld [vmem:[%s2444_s5 + $0x8] sm:$0xff] }
  0x19   : > { %v1124_v58 = vld [vmem:[%s2444_s5] sm:$0xff]  ;;  %v1127_v59 = vld [vmem:[%s2444_s5 + $0x18] sm:$0xff]  ;;  %v1126_v60 = vld [vmem:[%s2444_s5 + $0x10] sm:$0xff] }
  0x1a   : > { %v1316_v61 = vld [vmem:[%s2445_s6] sm:$0xff]  ;;  %v1129_v63 = vld [vmem:[%s2444_s5 + $0x28] sm:$0xff]  ;;  %v1130_v1 = vld [vmem:[%s2444_s5 + $0x30] sm:$0xff] }
  0x1b   : > { %v1128_v62 = vld [vmem:[%s2444_s5 + $0x20] sm:$0xff]  ;;  %v1317_v0 = vld [vmem:[%s2445_s6 + $0x8] sm:$0xff]  ;;  %v1318_v3 = vld [vmem:[%s2445_s6 + $0x10] sm:$0xff] }
  0x1c   : > { %615 = vperm.xlu1 %1676, %v1615_v11   ;;  %610 = vperm.xlu0 %1675, %v1614_v12   ;;  %v1131_v6 = vld [vmem:[%s2444_s5 + $0x38] sm:$0xff]  ;;  %v1132_v10 = vld [vmem:[%s2444_s5 + $0x40] sm:$0xff] }
  0x1d   : > { %v1319_v7 = vld [vmem:[%s2445_s6 + $0x18] sm:$0xff]  ;;  %v1320_v11 = vld [vmem:[%s2445_s6 + $0x20] sm:$0xff] }
  0x20   : > { %526 = vperm.xlu1 %1676, %v1609_v13   ;;  %521 = vperm.xlu0 %1675, %v1608_v14   ;;  %v367_v14 = vlaneseq }
  0x22   : > { %vm1506_vm1 = vcmp.lt.s32.totalorder %v367_v14, 256 }
  0x24   : > { %353 = vperm.xlu1 %1676, %v323_v15   ;;  %348 = vperm.xlu0 %1675, %v322_v16   ;;  %v1133_v15 = vld [vmem:[%s2444_s5 + $0x48] sm:$0xff] }
  0x25   : > { %v1321_v16 = vld [vmem:[%s2445_s6 + $0x28] sm:$0xff] }
  0x28   : > { %437 = vperm.xlu1 %1676, %v1603_v17   ;;  %432 = vperm.xlu0 %1675, %v1602_v18  }
  0x2c   : > { %625 = vperm.xlu1 %1676, %v1617_v19   ;;  %620 = vperm.xlu0 %1675, %v1616_v20   ;;  %v2013_v19 = vshrl.u32 %v367_v14, 7  ;;  %v1134_v20 = vld [vmem:[%s2444_s5 + $0x50] sm:$0xff] }
  0x30   : > { %713 = vperm.xlu1 %1676, %v699_v21   ;;  %708 = vperm.xlu0 %1675, %v698_v22   ;;  %v1322_v21 = vld [vmem:[%s2445_s6 + $0x30] sm:$0xff] }
  0x34   : > { %536 = vperm.xlu1 %1676, %v1611_v23   ;;  %531 = vperm.xlu0 %1675, %v1610_v24   ;;  %v452_v24 = vsub.s32 1, %v2013_v19 }
  0x38   : > { %363 = vperm.xlu1 %1676, %v325_v25   ;;  %358 = vperm.xlu0 %1675, %v324_v26   ;;  %v456_v25 = vsub.s32 5, %v2013_v19  ;;  %v369_v26 = vsub.s32 0, %v2013_v19 }
  0x3c   : > { %447 = vperm.xlu1 %1676, %v1605_v27   ;;  %442 = vperm.xlu0 %1675, %v1604_v28   ;;  %v373_v27 = vsub.s32 4, %v2013_v19  ;;  %v317_v28 = vld [vmem:[%s305_s21] sm:$0xff] }
  0x40   : > { %635 = vperm.xlu1 %1676, %v1619_v29   ;;  %630 = vperm.xlu0 %1675, %v1618_v30   ;;  %v1135_v29 = vld [vmem:[%s2444_s5 + $0x58] sm:$0xff] }
  0x41   : > { %v1323_v30 = vld [vmem:[%s2445_s6 + $0x38] sm:$0xff] }
  0x44   : > { %723 = vperm.xlu1 %1676, %v701_v31   ;;  %718 = vperm.xlu0 %1675, %v700_v32   ;;  %v551_v31 = vsub.s32 2, %v2013_v19  ;;  %v555_v32 = vsub.s32 6, %v2013_v19 }
  0x48   : > { %546 = vperm.xlu1 %1676, %v1613_v33   ;;  %541 = vperm.xlu0 %1675, %v1612_v34  }
  0x4c   : > { %645 = vperm.xlu1 %1676, %v1621_v35   ;;  %640 = vperm.xlu0 %1675, %v1620_v36   ;;  %v453_v35 = vrot.slane %v317_v28, %v452_v24  ;;  %v457_v36 = vrot.slane %v317_v28, %v456_v25 }
  0x50   : > { %733 = vperm.xlu1 %1676, %v703_v37   ;;  %728 = vperm.xlu0 %1675, %v702_v38   ;;  %v370_v37 = vrot.slane %v317_v28, %v369_v26  ;;  %v374_v38 = vrot.slane %v317_v28, %v373_v27 }
  0x54   : > { %743 = vperm.xlu1 %1676, %v705_v39   ;;  %738 = vperm.xlu0 %1675, %v704_v40   ;;  %v1136_v39 = vld [vmem:[%s2444_s5 + $0x60] sm:$0xff]  ;;  %v650_v40 = vsub.s32 3, %v2013_v19 }
  0x58   : > { %1019 = vperm.xlu1 %1676, %v997_v41   ;;  %1014 = vperm.xlu0 %1675, %v996_v42   ;;  %v654_v41 = vsub.s32 7, %v2013_v19  ;;  %v1324_v42 = vld [vmem:[%s2445_s6 + $0x40] sm:$0xff] }
  0x5c   : > { %1029 = vperm.xlu1 %1676, %v999_v43   ;;  %1024 = vperm.xlu0 %1675, %v998_v44   ;;  %v552_v43 = vrot.slane %v317_v28, %v551_v31  ;;  %v556_v44 = vrot.slane %v317_v28, %v555_v32 }
  0x60   : > { %1039 = vperm.xlu1 %1676, %v1001_v45   ;;  %1034 = vperm.xlu0 %1675, %v1000_v46  }
  0x64   : > { %1049 = vperm.xlu1 %1676, %v1003_v47   ;;  %1044 = vperm.xlu0 %1675, %v1002_v48   ;;  %v2052_v47 = vrot.slane %v453_v35, %v452_v24  ;;  %v2054_v48 = vrot.slane %v457_v36, %v452_v24 }
  0x68   : > { %1059 = vperm.xlu1 %1676, %v1005_v49   ;;  %1054 = vperm.xlu0 %1675, %v1004_v50   ;;  %v2056_v49 = vrot.slane %v370_v37, %v369_v26  ;;  %v2058_v50 = vrot.slane %v374_v38, %v369_v26  ;;  %v1139_v26 = vld [vmem:[%s2444_s5 + $0x78] sm:$0xff] }
  0x6c   : > { %1069 = vperm.xlu1 %1676, %v1007_v51   ;;  %1064 = vperm.xlu0 %1675, %v1006_v52   ;;  %v1137_v51 = vld [vmem:[%s2444_s5 + $0x68] sm:$0xff]  ;;  %v651_v52 = vrot.slane %v317_v28, %v650_v40 }
  0x70   : > { %1079 = vperm.xlu1 %1676, %v1009_v53   ;;  %1074 = vperm.xlu0 %1675, %v1008_v54   ;;  %v655_v53 = vrot.slane %v317_v28, %v654_v41  ;;  %v1325_v54 = vld [vmem:[%s2445_s6 + $0x48] sm:$0xff]  ;;  %v1328_v41 = vld [vmem:[%s2445_s6 + $0x60] sm:$0xff] }
  0x74   : > { %1089 = vperm.xlu1 %1676, %v1011_v55   ;;  %1084 = vperm.xlu0 %1675, %v1010_v56   ;;  %v2066_v55 = vrot.slane %v552_v43, %v551_v31  ;;  %v2068_v56 = vrot.slane %v556_v44, %v551_v31 }
  0x78   : > { %1147 = vperm.xlu1 %1676, %v1125_v57   ;;  %1142 = vperm.xlu0 %1675, %v1124_v58  }
  0x7c   : > { %1157 = vperm.xlu1 %1676, %v1127_v59   ;;  %1152 = vperm.xlu0 %1675, %v1126_v60  }
  0x80   : > { %1334 = vperm.xlu1 %1676, %v1316_v61   ;;  %1162 = vperm.xlu0 %1675, %v1128_v62  }
  0x84   : > { %1167 = vperm.xlu1 %1676, %v1129_v63   ;;  %1339 = vperm.xlu0 %1675, %v1317_v0  }
  0x87   : > { %v1973_v4 = vpop.permute.xlu1 %412  ;;  %v1975_v5 = vpop.permute.xlu0 %328 }
  0x88   : > { %1172 = vperm.xlu1 %1676, %v1130_v1   ;;  %1344 = vperm.xlu0 %1675, %v1318_v3   ;;  %v468_v59 = vmul.f32 %v2052_v47, %v1973_v4  ;;  %v469_v60 = vmul.f32 %v2054_v48, %v1973_v4  ;;  %v385_v61 = vmul.f32 %v2056_v49, %v1975_v5  ;;  %v1138_v4 = vld [vmem:[%s2444_s5 + $0x70] sm:$0xff] }
  0x89   : > { %v386_v62 = vmul.f32 %v2058_v50, %v1975_v5  ;;  %v2095_v5 = vrot.slane %v655_v53, %v650_v40 }
  0x8b   : > { %v1984_v8 = vpop.permute.xlu1 %417  ;;  %v1986_v9 = vpop.permute.xlu0 %333 }
  0x8c   : > { %1177 = vperm.xlu1 %1676, %v1131_v6   ;;  %1349 = vperm.xlu0 %1675, %v1319_v7   ;;  %v470_v63 = vmul.f32 %v2052_v47, %v1984_v8  ;;  %v471_v0 = vmul.f32 %v2054_v48, %v1984_v8  ;;  %v387_v1 = vmul.f32 %v2056_v49, %v1986_v9  ;;  %v1326_v7 = vld [vmem:[%s2445_s6 + $0x50] sm:$0xff] }
  0x8d   : > { %v388_v3 = vmul.f32 %v2058_v50, %v1986_v9  ;;  %v2093_v6 = vrot.slane %v651_v52, %v650_v40 }
  0x8e   : > { %v486_v24 = vadd.f32 %v470_v63, %v387_v1 }
  0x8f   : > { %v1997_v12 = vpop.permute.xlu1 %516  ;;  %v1999_v13 = vpop.permute.xlu0 %511  ;;  %v487_v25 = vadd.f32 %v471_v0, %v388_v3 }
  0x90   : > { %1182 = vperm.xlu1 %1676, %v1132_v10   ;;  %1354 = vperm.xlu0 %1675, %v1320_v11   ;;  %v569_v9 = vmul.f32 %v2066_v55, %v1997_v12  ;;  %v570_v11 = vmul.f32 %v2068_v56, %v1997_v12 }
  0x92   : > { %v585_v32 = vadd.f32 %v569_v9, %v486_v24  ;;  %v586_v35 = vadd.f32 %v570_v11, %v487_v25 }
  0x93   : > { %v2008_v17 = vpop.permute.xlu1 %343  ;;  %v2010_v18 = vpop.permute.xlu0 %338 }
  0x94   : > { %1187 = vperm.xlu1 %1676, %v1133_v15   ;;  %1359 = vperm.xlu0 %1675, %v1321_v16   ;;  %v567_v15 = vmul.f32 %v2066_v55, %v1999_v13  ;;  %v568_v16 = vmul.f32 %v2068_v56, %v1999_v13  ;;  %v1327_v13 = vld [vmem:[%s2445_s6 + $0x58] sm:$0xff] }
  0x97   : > { %v2024_v22 = vpop.permute.xlu1 %427  ;;  %v2026_v23 = vpop.permute.xlu0 %422 }
  0x98   : > { %1192 = vperm.xlu1 %1676, %v1134_v20   ;;  %1364 = vperm.xlu0 %1675, %v1322_v21   ;;  %v484_v20 = vadd.f32 %v468_v59, %v385_v61  ;;  %v485_v21 = vadd.f32 %v469_v60, %v386_v62  ;;  %v1330_v59 = vld [vmem:[%s2445_s6 + $0x70] sm:$0xff]  ;;  %v474_v11 = vmul.f32 %v2052_v47, %v2024_v22 }
  0x9a   : > { %v583_v36 = vadd.f32 %v567_v15, %v484_v20  ;;  %v584_v37 = vadd.f32 %v568_v16, %v485_v21  ;;  %v475_v15 = vmul.f32 %v2054_v48, %v2024_v22  ;;  %v472_v16 = vmul.f32 %v2052_v47, %v2026_v23 }
  0x9b   : > { %v616_v33 = vpop.permute.xlu1 %615  ;;  %v611_v34 = vpop.permute.xlu0 %610 }
  0x9c   : > { %1197 = vperm.xlu1 %1676, %v1135_v29   ;;  %1369 = vperm.xlu0 %1675, %v1323_v30   ;;  %v668_v27 = vmul.f32 %v2093_v6, %v616_v33  ;;  %v669_v12 = vmul.f32 %v2095_v5, %v616_v33  ;;  %v666_v28 = vmul.f32 %v2093_v6, %v611_v34  ;;  %v1329_v33 = vld [vmem:[%s2445_s6 + $0x68] sm:$0xff] }
  0x9d   : > { %v667_v29 = vmul.f32 %v2095_v5, %v611_v34 }
  0x9e   : > { %v684_v38 = vadd.f32 %v668_v27, %v585_v32  ;;  %v685_v34 = vadd.f32 %v669_v12, %v586_v35  ;;  %v392_v27 = vmul.f32 %v2058_v50, %v2008_v17  ;;  %v473_v12 = vmul.f32 %v2054_v48, %v2026_v23 }
  0x9f   : > { %v2048_v45 = vpop.permute.xlu1 %526  ;;  %v2050_v46 = vpop.permute.xlu0 %521  ;;  %v683_v40 = vadd.f32 %v667_v29, %v584_v37 }
  0xa0   : > { %1202 = vperm.xlu1 %1676, %v1136_v39   ;;  %1374 = vperm.xlu0 %1675, %v1324_v42   ;;  %v682_v39 = vadd.f32 %v666_v28, %v583_v36  ;;  %v573_v22 = vmul.f32 %v2066_v55, %v2048_v45  ;;  %v389_v28 = vmul.f32 %v2056_v49, %v2010_v18 }
  0xa1   : > { %v574_v29 = vmul.f32 %v2068_v56, %v2048_v45  ;;  %v491_v23 = vadd.f32 %v475_v15, %v392_v27  ;;  %v572_v45 = vmul.f32 %v2068_v56, %v2050_v46 }
  0xa2   : > { %v488_v35 = vadd.f32 %v472_v16, %v389_v28 }
  0xa3   : > { %v2070_v57 = vpop.permute.xlu1 %353  ;;  %v2072_v58 = vpop.permute.xlu0 %348 }
  0xa4   : > { %1207 = vperm.xlu1 %1676, %v1137_v51   ;;  %1379 = vperm.xlu0 %1675, %v1325_v54   ;;  %v1331_v54 = vld [vmem:[%s2445_s6 + $0x78] sm:$0xff] }
  0xa7   : > { %v2100_v8 = vpop.permute.xlu1 %437  ;;  %v2102_v10 = vpop.permute.xlu0 %432 }
  0xa8   : > { %1212 = vperm.xlu1 %1676, %v1138_v4   ;;  %1384 = vperm.xlu0 %1675, %v1326_v7  }
  0xab   : > { %v2122_v30 = vpop.permute.xlu1 %625  ;;  %v2124_v31 = vpop.permute.xlu0 %620 }
  0xac   : > { %1217 = vperm.xlu1 %1676, %v1139_v26   ;;  %1389 = vperm.xlu0 %1675, %v1327_v13   ;;  %v391_v26 = vmul.f32 %v2056_v49, %v2008_v17  ;;  %v571_v13 = vmul.f32 %v2066_v55, %v2050_v46  ;;  %v390_v17 = vmul.f32 %v2058_v50, %v2010_v18 }
  0xad   : > { %v478_v18 = vmul.f32 %v2052_v47, %v2100_v8  ;;  %v671_v46 = vmul.f32 %v2095_v5, %v2124_v31 }
  0xae   : > { %v490_v32 = vadd.f32 %v474_v11, %v391_v26 }
  0xaf   : > { %v714_v42 = vpop.permute.xlu1 %713  ;;  %v709_v43 = vpop.permute.xlu0 %708 }
  0xb0   : > { %v748_v44 = vadd.f32 %v714_v42, %v684_v38  ;;  %v749_v51 = vadd.f32 %v714_v42, %v685_v34  ;;  %v746_v52 = vadd.f32 %v709_v43, %v682_v39  ;;  %v747_v53 = vadd.f32 %v709_v43, %v683_v40  ;;  %1399 = vperm.xlu1 %1676, %v1329_v33  }
  0xb1   : > { %1394 = vperm.xlu0 %1675, %v1328_v41   ;;  %v489_v33 = vadd.f32 %v473_v12, %v390_v17  ;;  %v589_v38 = vadd.f32 %v573_v22, %v490_v32  ;;  %v590_v34 = vadd.f32 %v574_v29, %v491_v23  ;;  %v587_v39 = vadd.f32 %v571_v13, %v488_v35 }
  0xb2   : > { %v764_v60 = vmul.f32 0.2, %v748_v44  ;;  %v765_v61 = vmul.f32 0.2, %v749_v51  ;;  %v762_v62 = vmul.f32 0.2, %v746_v52  ;;  %v395_v40 = vmul.f32 %v2056_v49, %v2070_v57 }
  0xb3   : > { %v763_v63 = vmul.f32 0.2, %v747_v53  ;;  %v537_v0 = vpop.permute.xlu1 %536  ;;  %v532_v1 = vpop.permute.xlu0 %531  ;;  %v672_v41 = vmul.f32 %v2093_v6, %v2122_v30  ;;  %v673_v42 = vmul.f32 %v2095_v5, %v2122_v30  ;;  %v670_v43 = vmul.f32 %v2093_v6, %v2124_v31 }
  0xb4   : > { %1409 = vperm.xlu1 %1676, %v1331_v54   ;;  %v781_v4 = vmax.f32 %v749_v51, %v765_v61  ;;  %v778_v7 = vmax.f32 %v746_v52, %v762_v62  ;;  %v780_v9 = vmax.f32 %v748_v44, %v764_v60  ;;  %v479_v44 = vmul.f32 %v2054_v48, %v2100_v8 }
  0xb5   : > { %1404 = vperm.xlu0 %1675, %v1330_v59   ;;  %v779_v3 = vmax.f32 %v747_v53, %v763_v63  ;;  %v476_v51 = vmul.f32 %v2052_v47, %v2102_v10  ;;  %v477_v52 = vmul.f32 %v2054_v48, %v2102_v10  ;;  %v577_v53 = vmul.f32 %v2066_v55, %v537_v0 }
  0xb6   : > { %v794_v25 = vpack.c.bf16 %v780_v9, %v778_v7  ;;  %v588_v30 = vadd.f32 %v572_v45, %v489_v33  ;;  %v396_v60 = vmul.f32 %v2058_v50, %v2070_v57  ;;  %v393_v31 = vmul.f32 %v2056_v49, %v2072_v58 }
  0xb7   : > { %v2144_v20 = vpop.permute.xlu1 %363  ;;  %v2146_v21 = vpop.permute.xlu0 %358  ;;  %v795_v24 = vpack.c.bf16 %v781_v4, %v779_v3  ;;  %v394_v8 = vmul.f32 %v2058_v50, %v2072_v58  ;;  %v494_v61 = vadd.f32 %v478_v18, %v395_v40  ;;  %v578_v62 = vmul.f32 %v2068_v56, %v537_v0 }
  0xb8   : > { %v575_v63 = vmul.f32 %v2066_v55, %v532_v1  ;;  %v576_v10 = vmul.f32 %v2068_v56, %v532_v1  ;;  %v688_v3 = vadd.f32 %v672_v41, %v589_v38  ;;  %v689_v4 = vadd.f32 %v673_v42, %v590_v34 }
  0xb9   : > { %883 = vmatprep.subr.bf16.mxu0 %v795_v24  ;;  %1641 = vmatprep.subr.bf16.mxu1 %v795_v24  ;;  %v686_v7 = vadd.f32 %v670_v43, %v587_v39  ;;  %v687_v9 = vadd.f32 %v671_v46, %v588_v30  ;;  %v495_v11 = vadd.f32 %v479_v44, %v396_v60 }
  0xba   : > { %884 = vmatpush1.bf16.msra.mxu0 %v794_v25  ;;  %1645 = vmatpush1.bf16.msra.mxu1 %v794_v25  ;;  %v492_v15 = vadd.f32 %v476_v51, %v393_v31  ;;  %v493_v57 = vadd.f32 %v477_v52, %v394_v8  ;;  %v593_v16 = vadd.f32 %v577_v53, %v494_v61 }
  0xbb   : > { %v448_v36 = vpop.permute.xlu1 %447  ;;  %v443_v37 = vpop.permute.xlu0 %442  ;;  %v594_v22 = vadd.f32 %v578_v62, %v495_v11  ;;  %v400_v42 = vmul.f32 %v2058_v50, %v2144_v20 }
  0xbc   : > { %v591_v0 = vadd.f32 %v575_v63, %v492_v15  ;;  %v592_v28 = vadd.f32 %v576_v10, %v493_v57  ;;  %v482_v29 = vmul.f32 %v2052_v47, %v448_v36  ;;  %v483_v1 = vmul.f32 %v2054_v48, %v448_v36 }
  0xbd   : > { %v480_v23 = vmul.f32 %v2052_v47, %v443_v37  ;;  %v481_v35 = vmul.f32 %v2054_v48, %v443_v37  ;;  %v399_v36 = vmul.f32 %v2056_v49, %v2144_v20  ;;  %v397_v47 = vmul.f32 %v2056_v49, %v2146_v21 }
  0xbe   : > { %v398_v37 = vmul.f32 %v2058_v50, %v2146_v21  ;;  %v499_v52 = vadd.f32 %v483_v1, %v400_v42 }
  0xbf   : > { %v636_v54 = vpop.permute.xlu1 %635  ;;  %v631_v59 = vpop.permute.xlu0 %630  ;;  %v498_v51 = vadd.f32 %v482_v29, %v399_v36  ;;  %v496_v20 = vadd.f32 %v480_v23, %v397_v47 }
  0xc0   : > { %v676_v33 = vmul.f32 %v2093_v6, %v636_v54  ;;  %v677_v39 = vmul.f32 %v2095_v5, %v636_v54  ;;  %v674_v43 = vmul.f32 %v2093_v6, %v631_v59  ;;  %v675_v46 = vmul.f32 %v2095_v5, %v631_v59 }
  0xc1   : > { %v497_v31 = vadd.f32 %v481_v35, %v398_v37 }
  0xc2   : > { %v692_v8 = vadd.f32 %v676_v33, %v593_v16  ;;  %v693_v49 = vadd.f32 %v677_v39, %v594_v22  ;;  %v690_v62 = vadd.f32 %v674_v43, %v591_v0  ;;  %v691_v63 = vadd.f32 %v675_v46, %v592_v28  ;;  %v1677_v46 = vld [vmem:[%s2442_s3] sm:$0xff]  }
  0xc3   : > { %v724_v24 = vpop.permute.xlu1 %723  ;;  %v719_v25 = vpop.permute.xlu0 %718 }
  0xc4   : > { %v752_v26 = vadd.f32 %v724_v24, %v688_v3  ;;  %v753_v27 = vadd.f32 %v724_v24, %v689_v4  ;;  %v750_v58 = vadd.f32 %v719_v25, %v686_v7  ;;  %v751_v12 = vadd.f32 %v719_v25, %v687_v9 }
  0xc6   : > { %v768_v13 = vmul.f32 0.2, %v752_v26  ;;  %v769_v17 = vmul.f32 0.2, %v753_v27  ;;  %v766_v32 = vmul.f32 0.2, %v750_v58 }
  0xc7   : > { %v767_v38 = vmul.f32 0.2, %v751_v12  ;;  %v547_v45 = vpop.permute.xlu1 %546  ;;  %v542_v34 = vpop.permute.xlu0 %541 }
  0xc8   : > { %v784_v40 = vmax.f32 %v752_v26, %v768_v13  ;;  %v785_v18 = vmax.f32 %v753_v27, %v769_v17  ;;  %v782_v41 = vmax.f32 %v750_v58, %v766_v32  ;;  %v581_v53 = vmul.f32 %v2066_v55, %v547_v45 }
  0xc9   : > { %v783_v48 = vmax.f32 %v751_v12, %v767_v38  ;;  %v582_v61 = vmul.f32 %v2068_v56, %v547_v45  ;;  %v579_v50 = vmul.f32 %v2066_v55, %v542_v34  ;;  %v580_v21 = vmul.f32 %v2068_v56, %v542_v34 }
  0xca   : > { %v796_v44 = vpack.c.bf16 %v784_v40, %v782_v41  ;;  %v597_v10 = vadd.f32 %v581_v53, %v498_v51  ;;  %v1679_v51 = vld [vmem:[%s2442_s3 + $0x8] sm:$0xff]   ;;  %v1681_v53 = vld [vmem:[%s2442_s3 + $0x10] sm:$0xff]  }
  0xcb   : > { %v646_v54 = vpop.permute.xlu1 %645  ;;  %v641_v30 = vpop.permute.xlu0 %640  ;;  %v797_v60 = vpack.c.bf16 %v785_v18, %v783_v48  ;;  %v598_v16 = vadd.f32 %v582_v61, %v499_v52  ;;  %v595_v24 = vadd.f32 %v579_v50, %v496_v20  ;;  %v596_v25 = vadd.f32 %v580_v21, %v497_v31  ;;  %v1680_v52 = vld [vmem:[%s2442_s3 + $0x28] sm:$0xff]  }
  0xcc   : > { %v680_v59 = vmul.f32 %v2093_v6, %v646_v54  ;;  %v681_v3 = vmul.f32 %v2095_v5, %v646_v54  ;;  %v678_v4 = vmul.f32 %v2093_v6, %v641_v30  ;;  %v679_v7 = vmul.f32 %v2095_v5, %v641_v30  ;;  %v1682_v54 = vld [vmem:[%s2442_s3 + $0x30] sm:$0xff]   ;;  %v1683_v30 = vld [vmem:[%s2442_s3 + $0x18] sm:$0xff]  }
  0xcd   : > { %885 = vmatprep.subr.bf16.mxu0 %v797_v60  ;;  %1642 = vmatprep.subr.bf16.mxu1 %v797_v60  ;;  %v1684_v60 = vld [vmem:[%s2442_s3 + $0x38] sm:$0xff]  }
  0xce   : > { %886 = vmatpush1.bf16.msra.mxu0 %v796_v44  ;;  %1646 = vmatpush1.bf16.msra.mxu1 %v796_v44  ;;  %v696_v12 = vadd.f32 %v680_v59, %v597_v10  ;;  %v697_v28 = vadd.f32 %v681_v3, %v598_v16  ;;  %v694_v6 = vadd.f32 %v678_v4, %v595_v24  ;;  %v1678_v44 = vld [vmem:[%s2442_s3 + $0x20] sm:$0xff]  }
  0xcf   : > { %v734_v9 = vpop.permute.xlu1 %733  ;;  %v729_v11 = vpop.permute.xlu0 %728  ;;  %v695_v1 = vadd.f32 %v679_v7, %v596_v25 }
  0xd0   : > { %v756_v55 = vadd.f32 %v734_v9, %v692_v8  ;;  %v757_v15 = vadd.f32 %v734_v9, %v693_v49  ;;  %v754_v56 = vadd.f32 %v729_v11, %v690_v62  ;;  %v755_v57 = vadd.f32 %v729_v11, %v691_v63 }
  0xd2   : > { %v772_v26 = vmul.f32 0.2, %v756_v55  ;;  %v773_v27 = vmul.f32 0.2, %v757_v15  ;;  %v770_v58 = vmul.f32 0.2, %v754_v56 }
  0xd3   : > { %v771_v22 = vmul.f32 0.2, %v755_v57  ;;  %v744_v0 = vpop.permute.xlu1 %743  ;;  %v739_v29 = vpop.permute.xlu0 %738 }
  0xd4   : > { %v788_v5 = vmax.f32 %v756_v55, %v772_v26  ;;  %v789_v13 = vmax.f32 %v757_v15, %v773_v27  ;;  %v786_v17 = vmax.f32 %v754_v56, %v770_v58  ;;  %v760_v32 = vadd.f32 %v744_v0, %v696_v12 }
  0xd5   : > { %v787_v23 = vmax.f32 %v755_v57, %v771_v22  ;;  %v761_v35 = vadd.f32 %v744_v0, %v697_v28  ;;  %v758_v33 = vadd.f32 %v739_v29, %v694_v6  ;;  %v759_v38 = vadd.f32 %v739_v29, %v695_v1 }
  0xd6   : > { %v776_v45 = vmul.f32 0.2, %v760_v32  ;;  %v798_v34 = vpack.c.bf16 %v788_v5, %v786_v17 }
  0xd7   : > { %v777_v39 = vmul.f32 0.2, %v761_v35  ;;  %v774_v40 = vmul.f32 0.2, %v758_v33  ;;  %v775_v18 = vmul.f32 0.2, %v759_v38  ;;  %v799_v41 = vpack.c.bf16 %v789_v13, %v787_v23  ;;  %v1015_v20 = vpop.permute.xlu0 %1014  ;;  %v1020_v31 = vpop.permute.xlu1 %1019 }
  0xd8   : > { %v792_v36 = vmax.f32 %v760_v32, %v776_v45 }
  0xd9   : > { %v793_v42 = vmax.f32 %v761_v35, %v777_v39  ;;  %v790_v47 = vmax.f32 %v758_v33, %v774_v40  ;;  %v791_v48 = vmax.f32 %v759_v38, %v775_v18  ;;  %887 = vmatprep.subr.bf16.mxu0 %v799_v41  ;;  %1643 = vmatprep.subr.bf16.mxu1 %v799_v41 }
  0xda   : > { %888 = vmatpush1.bf16.msra.mxu0 %v798_v34  ;;  %1647 = vmatpush1.bf16.msra.mxu1 %v798_v34 }
  0xdb   : > { %v801_v37 = vpack.c.bf16 %v793_v42, %v791_v48  ;;  %v800_v43 = vpack.c.bf16 %v792_v36, %v790_v47  ;;  %v2256_v8 = vpop.permute.xlu0 %1024  ;;  %v2258_v49 = vpop.permute.xlu1 %1029 }
  0xdd   : > { %889 = vmatprep.subr.bf16.mxu0 %v801_v37  ;;  %1644 = vmatprep.subr.bf16.mxu1 %v801_v37 }
  0xde   : > { %890 = vmatpush1.bf16.msra.mxu0 %v800_v43  ;;  %1648 = vmatpush1.bf16.msra.mxu1 %v800_v43 }
  0xdf   : > { %v2260_v61 = vpop.permute.xlu0 %1034 }
  0xe1   : > { %1630 = vmatmul.mubr.msk.bf16.vlgmr.msra.gmra.mrb[0].mxu0 %vm858_vm0, %v1677_v46  ;;  %1634 = vmatmul.mubr.msk.bf16.vlgmr.msra.gmra.mrb[0].mxu1 %vm858_vm0, %v1678_v44 }
  0xe2   : > { %925 = vmatprep.mubr.bf16.mxu0 %v1709_v2  ;;  %965 = vmatprep.mubr.bf16.mxu1 %v1709_v2 }
  0xe3   : > { %v2264_v50 = vpop.permute.xlu0 %1044 }
  0xe7   : > { %v2268_v59 = vpop.permute.xlu0 %1054 }
  0xe9   : > { %1631 = vmatmul.mubr.msk.bf16.gmra.mrb[4].mxu0 %vm858_vm0, %v1679_v51  ;;  %1635 = vmatmul.mubr.msk.bf16.gmra.mrb[4].mxu1 %vm858_vm0, %v1680_v52 }
  0xea   : > { %935 = vmatprep.mubr.bf16.mxu0 %v1709_v2  ;;  %975 = vmatprep.mubr.bf16.mxu1 %v1709_v2 }
  0xeb   : > { %v2272_v63 = vpop.permute.xlu0 %1064 }
  0xef   : > { %v2276_v3 = vpop.permute.xlu0 %1074 }
  0xf1   : > { %1632 = vmatmul.mubr.msk.bf16.gmra.mrb[8].mxu0 %vm858_vm0, %v1681_v53  ;;  %1636 = vmatmul.mubr.msk.bf16.gmra.mrb[8].mxu1 %vm858_vm0, %v1682_v54 }
  0xf2   : > { %945 = vmatprep.mubr.bf16.mxu0 %v1709_v2  ;;  %985 = vmatprep.mubr.bf16.mxu1 %v1709_v2  ;;  %v2262_v2 = vpop.permute.xlu1 %1039 }
  0xf3   : > { %v2280_v7 = vpop.permute.xlu0 %1084 }
  0xf6   : > { %v2266_v21 = vpop.permute.xlu1 %1049 }
  0xf7   : > { %v1143_v11 = vpop.permute.xlu0 %1142 }
  0xf9   : > { %1633 = vmatmul.mubr.msk.bf16.gmra.mrb[12].mxu0 %vm858_vm0, %v1683_v30  ;;  %1637 = vmatmul.mubr.msk.bf16.gmra.mrb[12].mxu1 %vm858_vm0, %v1684_v60 }
  0xfa   : > { %v2270_v62 = vpop.permute.xlu1 %1059 }
  0xfb   : > { %v1153_v15 = vpop.permute.xlu0 %1152 }
  0xfe   : > { %v2274_v10 = vpop.permute.xlu1 %1069 }
  0xff   : > { %v2286_v57 = vpop.permute.xlu0 %1162 }
 0x102   : > { %v2278_v4 = vpop.permute.xlu1 %1079 }
 0x103   : > { %v1340_v24 = vpop.permute.xlu0 %1339 }
 0x106   : > { %v2282_v9 = vpop.permute.xlu1 %1089 }
 0x107   : > { %v2290_v26 = vpop.permute.xlu0 %1344 }
 0x10a   : > { %v1148_v55 = vpop.permute.xlu1 %1147 }
 0x10b   : > { %v2294_v58 = vpop.permute.xlu0 %1349 }
 0x10e   : > { %v2284_v56 = vpop.permute.xlu1 %1157 }
 0x10f   : > { %v2298_v22 = vpop.permute.xlu0 %1354 }
 0x112   : > { %v1335_v16 = vpop.permute.xlu1 %1334 }
 0x113   : > { %v2302_v28 = vpop.permute.xlu0 %1359 }
 0x116   : > { %v2288_v25 = vpop.permute.xlu1 %1167 }
 0x117   : > { %v2304_v47 = vpop.permute.xlu0 %1364 }
 0x11a   : > { %v2292_v27 = vpop.permute.xlu1 %1172 }
 0x11e   : > { %v2296_v12 = vpop.permute.xlu1 %1177 }
 0x122   : > { %v2300_v0 = vpop.permute.xlu1 %1182 }
 0x126   : > { %v1188_v42 = vpop.permute.xlu1 %1187 }
 0x1b4   : > { %v917_v29 = vpop.f32.mrb[0].mxu0  ;;  %v957_v6 = vpop.f32.mrb[0].mxu1 }
 0x1b5   : > { %v1092_v1 = vmul.f32 %v1015_v20, %v917_v29  ;;  %v919_v5 = vpop.f32.mrb[1].mxu0  ;;  %v959_v13 = vpop.f32.mrb[1].mxu1 }
 0x1b6   : > { %v1093_v17 = vmul.f32 %v1015_v20, %v919_v5  ;;  %v921_v32 = vpop.f32.mrb[2].mxu0  ;;  %v961_v23 = vpop.f32.mrb[2].mxu1 }
 0x1b7   : > { %v1220_v35 = vadd.f32 %v1143_v11, %v1092_v1  ;;  %v1094_v33 = vmul.f32 %v1020_v31, %v921_v32  ;;  %v923_v38 = vpop.f32.mrb[3].mxu0  ;;  %v963_v45 = vpop.f32.mrb[3].mxu1 }
 0x1b8   : > { %v1221_v34 = vadd.f32 %v1143_v11, %v1093_v17  ;;  %v1095_v39 = vmul.f32 %v1020_v31, %v923_v38 }
 0x1b9   : > { %v1252_v40 = vmul.f32 0.2, %v1220_v35  ;;  %v1222_v18 = vadd.f32 %v1148_v55, %v1094_v33 }
 0x1ba   : > { %v1253_v41 = vmul.f32 0.2, %v1221_v34  ;;  %v1223_v36 = vadd.f32 %v1148_v55, %v1095_v39 }
 0x1bb   : > { %v1284_v48 = vmax.f32 %v1220_v35, %v1252_v40  ;;  %v1254_v37 = vmul.f32 0.2, %v1222_v18 }
 0x1bc   : > { %v1285_v43 = vmax.f32 %v1221_v34, %v1253_v41  ;;  %v1255_v46 = vmul.f32 0.2, %v1223_v36  ;;  %v927_v44 = vpop.f32.mrb[4].mxu0  ;;  %v2306_v51 = vpop.f32.mrb[4].mxu1  ;;  %v1108_v34 = vmul.f32 %v2268_v59, %v957_v6 }
 0x1bd   : > { %v1286_v52 = vmax.f32 %v1222_v18, %v1254_v37  ;;  %v929_v53 = vpop.f32.mrb[5].mxu0  ;;  %v2308_v54 = vpop.f32.mrb[5].mxu1  ;;  %v1412_v31 = vmul.f32 %v1335_v16, %v1284_v48  ;;  %v1096_v55 = vmul.f32 %v2256_v8, %v927_v44 }
 0x1be   : > { %v1287_v30 = vmax.f32 %v1223_v36, %v1255_v46  ;;  %v931_v60 = vpop.f32.mrb[6].mxu0  ;;  %v2310_v20 = vpop.f32.mrb[6].mxu1  ;;  %v1413_v5 = vmul.f32 %v1335_v16, %v1285_v43  ;;  %v1097_v32 = vmul.f32 %v2256_v8, %v929_v53  ;;  %v1110_v8 = vmul.f32 %v2270_v62, %v961_v23 }
 0x1bf   : > { %v1414_v11 = vmul.f32 %v1340_v24, %v1286_v52  ;;  %v933_v29 = vpop.f32.mrb[7].mxu0  ;;  %v2313_v1 = vpop.f32.mrb[7].mxu1  ;;  %v1224_v33 = vadd.f32 %v1153_v15, %v1096_v55  ;;  %v1098_v38 = vmul.f32 %v2258_v49, %v931_v60  ;;  %v1111_v60 = vmul.f32 %v2270_v62, %v963_v45 }
 0x1c0   : > { %v1415_v17 = vmul.f32 %v1340_v24, %v1287_v30  ;;  %v1225_v40 = vadd.f32 %v1153_v15, %v1097_v32  ;;  %v2318_v18 = vpop.permute.xlu1 %1192  ;;  %v2320_v41 = vpop.permute.xlu0 %1369  ;;  %v1099_v16 = vmul.f32 %v2258_v49, %v933_v29  ;;  %v1109_v24 = vmul.f32 %v2268_v59, %v959_v13 }
 0x1c1   : > { %v1444_v35 = vadd.f32 %v1414_v11, %v1412_v31  ;;  %v1256_v36 = vmul.f32 0.2, %v1224_v33  ;;  %v1226_v48 = vadd.f32 %v2284_v56, %v1098_v38  ;;  %v1236_v30 = vadd.f32 %v2300_v0, %v1108_v34 }
 0x1c2   : > { %v1465_v39 = vadd.f32 %v1415_v17, %v1413_v5  ;;  %v1257_v37 = vmul.f32 0.2, %v1225_v40  ;;  %v1227_v15 = vadd.f32 %v2284_v56, %v1099_v16  ;;  %v1237_v56 = vadd.f32 %v2300_v0, %v1109_v24 }
 0x1c3   : > { %v1288_v6 = vmax.f32 %v1224_v33, %v1256_v36  ;;  %v1258_v44 = vmul.f32 0.2, %v1226_v48  ;;  %v1238_v5 = vadd.f32 %v1188_v42, %v1110_v8  ;;  %v1268_v34 = vmul.f32 0.2, %v1236_v30 }
 0x1c4   : > { %v937_v43 = vpop.f32.mrb[8].mxu0  ;;  %v2326_v46 = vpop.f32.mrb[8].mxu1  ;;  %v1289_v49 = vmax.f32 %v1225_v40, %v1257_v37  ;;  %v1259_v11 = vmul.f32 0.2, %v1227_v15  ;;  %v1239_v40 = vadd.f32 %v1188_v42, %v1111_v60 }
 0x1c5   : > { %v939_v52 = vpop.f32.mrb[9].mxu0  ;;  %v2329_v53 = vpop.f32.mrb[9].mxu1  ;;  %v1416_v13 = vmul.f32 %v2290_v26, %v1288_v6  ;;  %v1290_v23 = vmax.f32 %v1226_v48, %v1258_v44  ;;  %v1100_v45 = vmul.f32 %v2260_v61, %v937_v43  ;;  %v1270_v43 = vmul.f32 0.2, %v1238_v5 }
 0x1c6   : > { %v941_v31 = vpop.f32.mrb[10].mxu0  ;;  %v2333_v59 = vpop.f32.mrb[10].mxu1  ;;  %v1417_v17 = vmul.f32 %v2290_v26, %v1289_v49  ;;  %v1291_v62 = vmax.f32 %v1227_v15, %v1259_v11  ;;  %v1101_v24 = vmul.f32 %v2260_v61, %v939_v52  ;;  %v1269_v26 = vmul.f32 0.2, %v1237_v56 }
 0x1c7   : > { %v943_v55 = vpop.f32.mrb[11].mxu0  ;;  %v2336_v29 = vpop.f32.mrb[11].mxu1  ;;  %v1445_v32 = vadd.f32 %v1444_v35, %v1416_v13  ;;  %v1418_v33 = vmul.f32 %v2294_v58, %v1290_v23  ;;  %v1228_v0 = vadd.f32 %v2286_v57, %v1100_v45  ;;  %v1102_v35 = vmul.f32 %v2262_v2, %v941_v31 }
 0x1c8   : > { %v2342_v38 = vpop.permute.xlu1 %1197  ;;  %v1466_v36 = vadd.f32 %v1465_v39, %v1417_v17  ;;  %v1375_v48 = vpop.permute.xlu0 %1374  ;;  %v1419_v37 = vmul.f32 %v2294_v58, %v1291_v62  ;;  %v1229_v42 = vadd.f32 %v2286_v57, %v1101_v24  ;;  %v1300_v49 = vmax.f32 %v1236_v30, %v1268_v34 }
 0x1c9   : > { %v1446_v16 = vadd.f32 %v1445_v32, %v1418_v33  ;;  %v1260_v15 = vmul.f32 0.2, %v1228_v0  ;;  %v1230_v58 = vadd.f32 %v2288_v25, %v1102_v35  ;;  %v1103_v13 = vmul.f32 %v2262_v2, %v943_v55 }
 0x1ca   : > { %v1467_v44 = vadd.f32 %v1466_v36, %v1419_v37  ;;  %v1271_v31 = vmul.f32 0.2, %v1239_v40  ;;  %v1112_v23 = vmul.f32 %v2272_v63, %v2306_v51  ;;  %v1261_v17 = vmul.f32 0.2, %v1229_v42 }
 0x1cb   : > { %v1292_v11 = vmax.f32 %v1228_v0, %v1260_v15  ;;  %v1301_v62 = vmax.f32 %v1237_v56, %v1269_v26  ;;  %v1262_v45 = vmul.f32 0.2, %v1230_v58  ;;  %v1231_v30 = vadd.f32 %v2288_v25, %v1103_v13 }
 0x1cc   : > { %v947_v8 = vpop.f32.mrb[12].mxu0  ;;  %v2348_v6 = vpop.f32.mrb[12].mxu1  ;;  %v1302_v34 = vmax.f32 %v1238_v5, %v1270_v43  ;;  %v1113_v2 = vmul.f32 %v2272_v63, %v2308_v54  ;;  %v1293_v36 = vmax.f32 %v1229_v42, %v1261_v17  ;;  %v2365_v37 = vmul.f32 %v1375_v48, %v1300_v49 }
 0x1cd   : > { %v949_v39 = vpop.f32.mrb[13].mxu0  ;;  %v2351_v60 = vpop.f32.mrb[13].mxu1  ;;  %v1420_v55 = vmul.f32 %v2298_v22, %v1292_v11  ;;  %v1294_v51 = vmax.f32 %v1230_v58, %v1262_v45  ;;  %v1263_v0 = vmul.f32 0.2, %v1231_v30  ;;  %v1303_v24 = vmax.f32 %v1239_v40, %v1271_v31 }
 0x1ce   : > { %v951_v61 = vpop.f32.mrb[14].mxu0  ;;  %v2355_v52 = vpop.f32.mrb[14].mxu1  ;;  %v2368_v35 = vadd.f32 %v2318_v18, %v1112_v23  ;;  %v1421_v56 = vmul.f32 %v2298_v22, %v1293_v36  ;;  %v2371_v25 = vmul.f32 %v1375_v48, %v1301_v62  ;;  %v1104_v54 = vmul.f32 %v2264_v50, %v947_v8 }
 0x1cf   : > { %v953_v32 = vpop.f32.mrb[15].mxu0  ;;  %v2359_v33 = vpop.f32.mrb[15].mxu1  ;;  %v1447_v15 = vadd.f32 %v1446_v16, %v1420_v55  ;;  %v1422_v5 = vmul.f32 %v2302_v28, %v1294_v51  ;;  %v1295_v63 = vmax.f32 %v1231_v30, %v1263_v0  ;;  %v2378_v42 = vadd.f32 %v2318_v18, %v1113_v2 }
 0x1d0   : > { %v1203_v57 = vpop.permute.xlu1 %1202  ;;  %v1380_v26 = vpop.permute.xlu0 %1379  ;;  %v1114_v40 = vmul.f32 %v2274_v10, %v2310_v20  ;;  %v1468_v49 = vadd.f32 %v1467_v44, %v1421_v56  ;;  %v1232_v48 = vadd.f32 %v2292_v27, %v1104_v54  ;;  %v1105_v13 = vmul.f32 %v2264_v50, %v949_v39 }
 0x1d1   : > { %v2375_v43 = vmul.f32 %v1380_v26, %v1302_v34  ;;  %v1448_v58 = vadd.f32 %v1447_v15, %v1422_v5  ;;  %v1423_v22 = vmul.f32 %v2302_v28, %v1295_v63  ;;  %v2385_v31 = vmul.f32 %v1380_v26, %v1303_v24 }
 0x1d2   : > { %v1272_v8 = vmul.f32 0.2, %v2368_v35  ;;  %v1115_v18 = vmul.f32 %v2274_v10, %v2313_v1  ;;  %v1106_v23 = vmul.f32 %v2266_v21, %v951_v61  ;;  %v1116_v20 = vmul.f32 %v2276_v3, %v2326_v46 }
 0x1d3   : > { %v1469_v44 = vadd.f32 %v1468_v49, %v1423_v22  ;;  %v1264_v11 = vmul.f32 0.2, %v1232_v48  ;;  %v1233_v28 = vadd.f32 %v2292_v27, %v1105_v13  ;;  %v1273_v17 = vmul.f32 0.2, %v2378_v42 }
 0x1d4   : > { %v1208_v16 = vpop.permute.xlu1 %1207  ;;  %v1242_v50 = vadd.f32 %v2342_v38, %v1114_v40  ;;  %v1234_v39 = vadd.f32 %v2296_v12, %v1106_v23  ;;  %v1107_v62 = vmul.f32 %v2266_v21, %v953_v32  ;;  %v1385_v45 = vpop.permute.xlu0 %1384  ;;  %v1117_v10 = vmul.f32 %v2276_v3, %v2329_v53 }
 0x1d5   : > { %v1118_v1 = vmul.f32 %v2278_v4, %v2333_v59  ;;  %v1296_v46 = vmax.f32 %v1232_v48, %v1264_v11  ;;  %v1265_v61 = vmul.f32 0.2, %v1233_v28  ;;  %v1304_v30 = vmax.f32 %v2368_v35, %v1272_v8 }
 0x1d6   : > { %v1243_v27 = vadd.f32 %v2342_v38, %v1115_v18  ;;  %v1266_v34 = vmul.f32 0.2, %v1234_v39  ;;  %v1235_v2 = vadd.f32 %v2296_v12, %v1107_v62  ;;  %v1244_v36 = vadd.f32 %v1203_v57, %v1116_v20 }
 0x1d7   : > { %v1119_v21 = vmul.f32 %v2278_v4, %v2336_v29  ;;  %v1424_v32 = vmul.f32 %v2304_v47, %v1296_v46  ;;  %v1297_v3 = vmax.f32 %v1233_v28, %v1265_v61  ;;  %v1274_v53 = vmul.f32 0.2, %v1242_v50 }
 0x1d8   : > { %v1213_v55 = vpop.permute.xlu1 %1212  ;;  %v1120_v59 = vmul.f32 %v2280_v7, %v2348_v6  ;;  %v1298_v51 = vmax.f32 %v1234_v39, %v1266_v34  ;;  %v1267_v0 = vmul.f32 0.2, %v1235_v2  ;;  %v1245_v24 = vadd.f32 %v1203_v57, %v1117_v10  ;;  %v1390_v26 = vpop.permute.xlu0 %1389 }
 0x1d9   : > { %v1246_v35 = vadd.f32 %v1208_v16, %v1118_v1  ;;  %v1449_v38 = vadd.f32 %v1448_v58, %v1424_v32  ;;  %v1425_v15 = vmul.f32 %v2304_v47, %v1297_v3  ;;  %v1121_v12 = vmul.f32 %v2280_v7, %v2351_v60 }
 0x1da   : > { %v1426_v56 = vmul.f32 %v2320_v41, %v1298_v51  ;;  %v1122_v4 = vmul.f32 %v2282_v9, %v2355_v52  ;;  %v1299_v29 = vmax.f32 %v1235_v2, %v1267_v0  ;;  %v1275_v5 = vmul.f32 0.2, %v1243_v27 }
 0x1db   : > { %v1276_v63 = vmul.f32 0.2, %v1244_v36  ;;  %v1247_v6 = vadd.f32 %v1208_v16, %v1119_v21  ;;  %v1470_v54 = vadd.f32 %v1469_v44, %v1425_v15  ;;  %v1248_v40 = vadd.f32 %v1213_v55, %v1120_v59 }
 0x1dc   : > { %v1450_v57 = vadd.f32 %v1449_v38, %v1426_v56  ;;  %v1427_v49 = vmul.f32 %v2320_v41, %v1299_v29  ;;  %v1123_v47 = vmul.f32 %v2282_v9, %v2359_v33  ;;  %v1218_v58 = vpop.permute.xlu1 %1217  ;;  %v1305_v7 = vmax.f32 %v2378_v42, %v1273_v17  ;;  %v1395_v28 = vpop.permute.xlu0 %1394 }
 0x1dd   : > { %v1306_v60 = vmax.f32 %v1242_v50, %v1274_v53  ;;  %v1277_v22 = vmul.f32 0.2, %v1245_v24  ;;  %v1278_v48 = vmul.f32 0.2, %v1246_v35  ;;  %v1249_v52 = vadd.f32 %v1213_v55, %v1121_v12 }
 0x1de   : > { %v1451_v13 = vadd.f32 %v1450_v57, %v2365_v37  ;;  %v1250_v8 = vadd.f32 %v1218_v58, %v1122_v4  ;;  %v1471_v18 = vadd.f32 %v1470_v54, %v1427_v49  ;;  %v1432_v16 = vmul.f32 %v1385_v45, %v1304_v30 }
 0x1df   : > { %v1307_v23 = vmax.f32 %v1243_v27, %v1275_v5  ;;  %v1308_v20 = vmax.f32 %v1244_v36, %v1276_v63  ;;  %v1279_v44 = vmul.f32 0.2, %v1247_v6  ;;  %v1280_v11 = vmul.f32 0.2, %v1248_v40 }
 0x1e0   : > { %v1452_v41 = vadd.f32 %v1451_v13, %v2375_v43  ;;  %v1472_v9 = vadd.f32 %v1471_v18, %v2371_v25  ;;  %v1251_v33 = vadd.f32 %v1218_v58, %v1123_v47  ;;  %v1433_v42 = vmul.f32 %v1385_v45, %v1305_v7  ;;  %v1400_v46 = vpop.permute.xlu1 %1399  ;;  %v1405_v53 = vpop.permute.xlu0 %1404 }
 0x1e1   : > { %v1434_v17 = vmul.f32 %v1390_v26, %v1306_v60  ;;  %v1309_v50 = vmax.f32 %v1245_v24, %v1277_v22  ;;  %v1310_v39 = vmax.f32 %v1246_v35, %v1278_v48  ;;  %v1281_v62 = vmul.f32 0.2, %v1249_v52 }
 0x1e2   : > { %v1453_v10 = vadd.f32 %v1452_v41, %v1432_v16  ;;  %v1282_v37 = vmul.f32 0.2, %v1250_v8  ;;  %v1473_v1 = vadd.f32 %v1472_v9, %v2385_v31  ;;  %v1435_v61 = vmul.f32 %v1390_v26, %v1307_v23 }
 0x1e3   : > { %v1436_v30 = vmul.f32 %v1395_v28, %v1308_v20  ;;  %v1311_v27 = vmax.f32 %v1247_v6, %v1279_v44  ;;  %v1312_v34 = vmax.f32 %v1248_v40, %v1280_v11  ;;  %v1283_v55 = vmul.f32 0.2, %v1251_v33 }
 0x1e4   : > { %v1454_v2 = vadd.f32 %v1453_v10, %v1434_v17  ;;  %v1474_v43 = vadd.f32 %v1473_v1, %v1433_v42  ;;  %v1437_v25 = vmul.f32 %v1395_v28, %v1309_v50  ;;  %v1438_v36 = vmul.f32 %v1400_v46, %v1310_v39  ;;  %v1410_v35 = vpop.permute.xlu1 %1409 }
 0x1e5   : > { %v1313_v21 = vmax.f32 %v1249_v52, %v1281_v62  ;;  %v1314_v45 = vmax.f32 %v1250_v8, %v1282_v37  ;;  %v1439_v59 = vmul.f32 %v1400_v46, %v1311_v27  ;;  %v1440_v51 = vmul.f32 %v1405_v53, %v1312_v34 }
 0x1e6   : > { %v1455_v32 = vadd.f32 %v1454_v2, %v1436_v30  ;;  %v1475_v3 = vadd.f32 %v1474_v43, %v1435_v61  ;;  %v1315_v24 = vmax.f32 %v1251_v33, %v1283_v55  ;;  %v1710_v49 = vmov 1966171168  }
 0x1e7   : > { %v1441_v38 = vmul.f32 %v1405_v53, %v1313_v21  ;;  %v1442_v15 = vmul.f32 %v1410_v35, %v1314_v45  ;;  %v1490_v47 = vunpack.c.l.s4 %v1710_v49 }
 0x1e8   : > { %v1456_v0 = vadd.f32 %v1455_v32, %v1438_v36  ;;  %v1476_v31 = vadd.f32 %v1475_v3, %v1437_v25  ;;  %v1443_v29 = vmul.f32 %v1410_v35, %v1315_v24 }
 0x1e9   : > { %v1491_v48 = vunpack.c.0.s8 %v1490_v47 }
 0x1ea   : > { %v1457_v12 = vadd.f32 %v1456_v0, %v1440_v51  ;;  %v1477_v56 = vadd.f32 %v1476_v31, %v1439_v59 }
 0x1eb   : > { %v1494_v18 = vsub.s32 %v1491_v48, %v2013_v19 }
 0x1ec   : > { %v1458_v4 = vadd.f32 %v1457_v12, %v1442_v15  ;;  %v1478_v26 = vadd.f32 %v1477_v56, %v1441_v38 }
 0x1ee   : > { %v1459_v5 = vrot.slane %v1458_v4, 4  ;;  %v1479_v63 = vadd.f32 %v1478_v26, %v1443_v29 }
 0x1f0   : > { %v1460_v6 = vadd.f32 %v1459_v5, %v1458_v4  ;;  %v1480_v54 = vrot.slane %v1479_v63, 4 }
 0x1f2   : > { %v1461_v40 = vrot.slane %v1460_v6, 2  ;;  %v1481_v57 = vadd.f32 %v1480_v54, %v1479_v63 }
 0x1f4   : > { %v1462_v58 = vadd.f32 %v1461_v40, %v1460_v6  ;;  %v1482_v7 = vrot.slane %v1481_v57, 2 }
 0x1f6   : > { %v1463_v60 = vrot.slane %v1462_v58, 1  ;;  %v1483_v22 = vadd.f32 %v1482_v7, %v1481_v57 }
 0x1f8   : > { %v1464_v52 = vadd.f32 %v1463_v60, %v1462_v58  ;;  %v1484_v13 = vrot.slane %v1483_v22, 1 }
 0x1fa   : > { %v1485_v8 = vadd.f32 %v1484_v13, %v1483_v22 }
 0x1fc   : > { %v1488_v16 = vcombine.low %v1464_v52, %v1485_v8 }
 0x1fe   : > { %v1495_v23 = vrot.slane %v1488_v16, %v1494_v18 }
 0x200   : > { %v1502_v20 = vrot.slane %v1495_v23, %v1494_v18 }
 0x202   : > { %1508 = vst.msk [vmem:[%s314_s14] sm:$0x3] %vm1506_vm1, %v1502_v20 }
 0x203 PF: > { %s17_s26 = sadd.s32 1, %s1707_s26   ;;  %s2447_s24 = smov %s1703_s25 }
 0x204   : > { %p14_p5 = scmp.ge.s32.totalorder %s17_s26, 4   ;;  %s2448_s25 = smov %s2450_s27 }
 0x206   :  { %16 = sbr.rel (!%p14_p5) target bundleno = 2 (0x2), region = 81 }

</bundles_post_ra>
